<compile_context>
chip_gen: v6e
topology: v6e:2x2x1
jax: 0.10.0
libtpu: 0.0.40
codegen_flags: <defaults>
</compile_context>

<pallas_src>
from functools import lru_cache

import numpy as np
import jax
import jax.numpy as jnp
from jax.experimental import pallas as pl
from jax.experimental.pallas import tpu as pltpu

SAMPLE_RATE = 16000
N_MELS = 128
N_FFT = 1024
HOP = 250
N_FREQS = N_FFT // 2 + 1      # 513 onesided STFT bins
N_F = N_FFT // 2              # 512 usable bins (Nyquist fbank row is exactly 0)


# ---------------------------------------------------------------------------
# Deterministic "parameter" construction (hann window, DFT bases, mel fbank).
# Built once in float64 numpy for precision, cached, cast to bf16 for the MXU.
# ---------------------------------------------------------------------------
def _hann_window_periodic(n):
    k = np.arange(n, dtype=np.float64)
    return 0.5 - 0.5 * np.cos(2.0 * np.pi * k / n)


def _dft_basis(n_fft, n_freqs):
    # angle = 2*pi*k*n/n_fft ; integer mod keeps the argument small.
    n = np.arange(n_fft, dtype=np.int64)
    k = np.arange(n_freqs, dtype=np.int64)
    phase = (np.outer(n, k) % n_fft).astype(np.float64) * (2.0 * np.pi / n_fft)
    return np.cos(phase), np.sin(phase)  # each (n_fft, n_freqs)


def _melscale_fbanks(n_freqs, f_min, f_max, n_mels, sample_rate):
    # torchaudio.functional.melscale_fbanks, mel_scale="htk", norm=None
    def hz_to_mel(f):
        return 2595.0 * np.log10(1.0 + f / 700.0)

    def mel_to_hz(m):
        return 700.0 * (10.0 ** (m / 2595.0) - 1.0)

    all_freqs = np.linspace(0.0, sample_rate // 2, n_freqs)
    m_pts = np.linspace(hz_to_mel(f_min), hz_to_mel(f_max), n_mels + 2)
    f_pts = mel_to_hz(m_pts)
    f_diff = f_pts[1:] - f_pts[:-1]                       # (n_mels+1,)
    slopes = f_pts[None, :] - all_freqs[:, None]          # (n_freqs, n_mels+2)
    down = -slopes[:, :-2] / f_diff[:-1]
    up = slopes[:, 2:] / f_diff[1:]
    fb = np.maximum(0.0, np.minimum(down, up))            # (n_freqs, n_mels)
    return fb


@lru_cache(maxsize=1)
def _constants():
    """Windowed cos/sin DFT bases (N_FFT, N_F) and mel fbank (N_F, N_MELS), bf16."""
    window = _hann_window_periodic(N_FFT)                       # (n_fft,)
    cos_np, sin_np = _dft_basis(N_FFT, N_F)                     # (n_fft, 512) each
    cos_w = window[:, None] * cos_np                            # fold hann into basis
    sin_w = window[:, None] * sin_np
    # Full 513-bin fbank, then drop the Nyquist row (exactly zero) -> exact.
    fb_full = _melscale_fbanks(N_FREQS, 0.0, SAMPLE_RATE / 2.0, N_MELS, SAMPLE_RATE)
    fb = fb_full[:N_F, :]                                       # (512, n_mels)
    return (jnp.asarray(cos_w, jnp.bfloat16),
            jnp.asarray(sin_w, jnp.bfloat16),
            jnp.asarray(fb, jnp.bfloat16))


def _round_up(x, m):
    return ((x + m - 1) // m) * m


def _cdiv(a, b):
    return -(-a // b)


# ---------------------------------------------------------------------------
# Pallas kernel: one M-tile of frames -> windowed DFT -> power -> mel.
#   frames_ref : (TILE_M, N_FFT)   bf16 frames (hann window folded into bases)
#   cos_ref    : (N_FFT, N_F)      bf16 cos basis * hann
#   sin_ref    : (N_FFT, N_F)      bf16 sin basis * hann
#   fb_ref     : (N_F, N_MELS)     bf16 mel filterbank
#   out_ref    : (TILE_M, N_MELS)  f32
# ---------------------------------------------------------------------------
def mel_kernel(frames_ref, cos_ref, sin_ref, fb_ref, out_ref):
    f = frames_ref[...]
    re = jnp.dot(f, cos_ref[...], preferred_element_type=jnp.float32)   # (TILE_M, N_F)
    im = jnp.dot(f, sin_ref[...], preferred_element_type=jnp.float32)   # (TILE_M, N_F)
    power = re * re + im * im                                            # f32, VPU
    out_ref[...] = jnp.dot(power.astype(jnp.bfloat16), fb_ref[...],
                           preferred_element_type=jnp.float32)           # (TILE_M, N_MELS)


# ---------------------------------------------------------------------------
# Host-side glue
# ---------------------------------------------------------------------------
def _frame_signal(x_pad, n_frames):
    """Overlapping frames from HOP-sized blocks via slices + concat (no gather,
    no index constant).  x_pad: (B, t_pad) -> (B, n_frames, N_FFT)."""
    B = x_pad.shape[0]
    chunks = _cdiv(N_FFT, HOP)                 # 5
    rem = N_FFT - (chunks - 1) * HOP           # 24
    L = (n_frames + chunks - 1) * HOP          # samples needed for full blocks
    t_pad = x_pad.shape[1]
    if t_pad < L:
        x_pad = jnp.pad(x_pad, ((0, 0), (0, L - t_pad)))   # never read by real frames
    else:
        x_pad = x_pad[:, :L]
    blocks = x_pad.reshape(B, n_frames + chunks - 1, HOP)
    parts = [blocks[:, c:c + n_frames] for c in range(chunks - 1)]
    parts.append(blocks[:, chunks - 1:chunks - 1 + n_frames, :rem])
    return jnp.concatenate(parts, axis=2)      # (B, n_frames, N_FFT)


def _choose_tiling(M, tile_m):
    """Tile the folded batch*frames dim: multiple of 16 sublanes (bf16), minimal
    tail padding, and >= 2 grid steps when M allows (v7x 2-TC megacore)."""
    n_steps = max(1, _cdiv(M, tile_m))
    if n_steps == 1 and M > 16:
        n_steps = 2
    tile = _round_up(_cdiv(M, n_steps), 16)
    n_steps = _cdiv(M, tile)
    return tile, tile * n_steps


def mel_spectrogram(waveform: jnp.ndarray, *, tile_m: int = 512) -> jnp.ndarray:
    """waveform: (batch, T) float32 -> (batch, n_mels, n_frames) float32."""
    batch, T = waveform.shape
    pad = N_FFT // 2

    # center=True reflect padding (matches torch for T > n_fft // 2).
    x_pad = jnp.pad(waveform.astype(jnp.float32), ((0, 0), (pad, pad)), mode="reflect")
    n_frames = T // HOP + 1

    # bf16 frames: the MXU operands are bf16 anyway, and this halves the
    # streamed HBM read of the framed signal.
    frames = _frame_signal(x_pad.astype(jnp.bfloat16), n_frames)   # (B, n_frames, n_fft)

    # Fold batch*frames into a single tiled M dimension.
    M = batch * n_frames
    frames2d = frames.reshape(M, N_FFT)
    tile, m_pad = _choose_tiling(M, tile_m)
    if m_pad != M:
        frames2d = jnp.pad(frames2d, ((0, m_pad - M), (0, 0)))

    cos_w, sin_w, fb = _constants()

    out = pl.pallas_call(
        mel_kernel,
        out_shape=jax.ShapeDtypeStruct((m_pad, N_MELS), jnp.float32),
        grid_spec=pltpu.PrefetchScalarGridSpec(
            num_scalar_prefetch=0,
            grid=(m_pad // tile,),
            in_specs=[
                pl.BlockSpec((tile, N_FFT), lambda m: (m, 0)),     # frames tile (bf16)
                pl.BlockSpec((N_FFT, N_F), lambda m: (0, 0)),      # cos * hann (bf16)
                pl.BlockSpec((N_FFT, N_F), lambda m: (0, 0)),      # sin * hann (bf16)
                pl.BlockSpec((N_F, N_MELS), lambda m: (0, 0)),     # mel fbank  (bf16)
            ],
            out_specs=pl.BlockSpec((tile, N_MELS), lambda m: (m, 0)),
        ),
        compiler_params=pltpu.CompilerParams(
            dimension_semantics=("parallel",),
            vmem_limit_bytes=32 * 1024 * 1024,   # usage ~10 MiB at tile 512; fits v5e/v6e/v7x
        ),
    )(frames2d, cos_w, sin_w, fb)

    mel = out[:M].reshape(batch, n_frames, N_MELS)
    # TODO(synk): drop this transpose if the consumer accepts (batch, n_frames, n_mels).
    return jnp.transpose(mel, (0, 2, 1))


if __name__ == "__main__":
    key = jax.random.PRNGKey(0)
    batch, T = 2, 2000                          # n_frames = 2000 // 250 + 1 = 9
    waveform = jax.random.normal(key, (batch, T), dtype=jnp.float32)

    mel = mel_spectrogram(waveform)
    jax.block_until_ready(mel)

    assert mel.shape == (batch, N_MELS, T // HOP + 1)
    assert mel.dtype == jnp.float32
    assert bool(jnp.all(jnp.isfinite(mel)))
    print("KERNEL_OK")
</pallas_src>

<mosaic_0001>
module attributes {stable_mosaic.version = 11 : i64} {
  func.func @mel_kernel(%arg0: i32, %arg1: memref<16x1024xbf16, #tpu.memory_space<vmem>>, %arg2: memref<1024x512xbf16, #tpu.memory_space<vmem>>, %arg3: memref<1024x512xbf16, #tpu.memory_space<vmem>>, %arg4: memref<512x128xbf16, #tpu.memory_space<vmem>>, %arg5: memref<16x128xf32, #tpu.memory_space<vmem>>) attributes {dimension_semantics = [#tpu.dimension_semantics<parallel>], iteration_bounds = array<i64: 2>, scalar_prefetch = 0 : i64, scratch_operands = 0 : i64, tpu.core_type = #tpu.core_type<tc>, window_params = [{transform_indices = @transform_0, window_bounds = array<i64: 16, 1024>}, {pipeline_mode = #tpu.pipeline_mode<synchronous>, transform_indices = @transform_1, window_bounds = array<i64: 1024, 512>}, {pipeline_mode = #tpu.pipeline_mode<synchronous>, transform_indices = @transform_2, window_bounds = array<i64: 1024, 512>}, {pipeline_mode = #tpu.pipeline_mode<synchronous>, transform_indices = @transform_3, window_bounds = array<i64: 512, 128>}, {transform_indices = @transform_4, window_bounds = array<i64: 16, 128>}]} {
    %c0 = arith.constant 0 : index
    %c0_0 = arith.constant 0 : index
    %0 = vector.load %arg1[%c0, %c0_0] : memref<16x1024xbf16, #tpu.memory_space<vmem>>, vector<16x1024xbf16>
    %c0_1 = arith.constant 0 : index
    %c0_2 = arith.constant 0 : index
    %1 = vector.load %arg2[%c0_1, %c0_2] : memref<1024x512xbf16, #tpu.memory_space<vmem>>, vector<1024x512xbf16>
    %cst = arith.constant dense<0.000000e+00> : vector<16x512xf32>
    %2 = tpu.matmul %0, %1, %cst {dimension_numbers = #tpu.dot_dimension_numbers<[1], [0], [0], [1], [0, 0, 1, 1], [], []>} : vector<16x1024xbf16>, vector<1024x512xbf16>, vector<16x512xf32> -> vector<16x512xf32>
    %c0_3 = arith.constant 0 : index
    %c0_4 = arith.constant 0 : index
    %3 = vector.load %arg3[%c0_3, %c0_4] : memref<1024x512xbf16, #tpu.memory_space<vmem>>, vector<1024x512xbf16>
    %cst_5 = arith.constant dense<0.000000e+00> : vector<16x512xf32>
    %4 = tpu.matmul %0, %3, %cst_5 {dimension_numbers = #tpu.dot_dimension_numbers<[1], [0], [0], [1], [0, 0, 1, 1], [], []>} : vector<16x1024xbf16>, vector<1024x512xbf16>, vector<16x512xf32> -> vector<16x512xf32>
    %5 = arith.mulf %2, %2 : vector<16x512xf32>
    %6 = arith.mulf %4, %4 : vector<16x512xf32>
    %7 = arith.addf %5, %6 : vector<16x512xf32>
    %8 = arith.truncf %7 : vector<16x512xf32> to vector<16x512xbf16>
    %c0_6 = arith.constant 0 : index
    %c0_7 = arith.constant 0 : index
    %9 = vector.load %arg4[%c0_6, %c0_7] : memref<512x128xbf16, #tpu.memory_space<vmem>>, vector<512x128xbf16>
    %cst_8 = arith.constant dense<0.000000e+00> : vector<16x128xf32>
    %10 = tpu.matmul %8, %9, %cst_8 {dimension_numbers = #tpu.dot_dimension_numbers<[1], [0], [0], [1], [0, 0, 1, 1], [], []>} : vector<16x512xbf16>, vector<512x128xbf16>, vector<16x128xf32> -> vector<16x128xf32>
    %c0_9 = arith.constant 0 : index
    %c0_10 = arith.constant 0 : index
    %11 = vector.load %arg5[%c0_9, %c0_10] : memref<16x128xf32, #tpu.memory_space<vmem>>, vector<16x128xf32>
    tpu.vector_store %arg5[%c0_9, %c0_10], %10 {strides = array<i32>} : memref<16x128xf32, #tpu.memory_space<vmem>>, vector<16x128xf32>,
    return
  }
  func.func @transform_0(%arg0: i32) -> (i32, i32) {
    %c0_i32 = arith.constant 0 : i32
    %c0_i32_0 = arith.constant 0 : i32
    return %arg0, %c0_i32 : i32, i32
  }
  func.func @transform_1(%arg0: i32) -> (i32, i32) {
    %c0_i32 = arith.constant 0 : i32
    %c0_i32_0 = arith.constant 0 : i32
    %c0_i32_1 = arith.constant 0 : i32
    return %c0_i32, %c0_i32_0 : i32, i32
  }
  func.func @transform_2(%arg0: i32) -> (i32, i32) {
    %c0_i32 = arith.constant 0 : i32
    %c0_i32_0 = arith.constant 0 : i32
    %c0_i32_1 = arith.constant 0 : i32
    return %c0_i32, %c0_i32_0 : i32, i32
  }
  func.func @transform_3(%arg0: i32) -> (i32, i32) {
    %c0_i32 = arith.constant 0 : i32
    %c0_i32_0 = arith.constant 0 : i32
    %c0_i32_1 = arith.constant 0 : i32
    return %c0_i32, %c0_i32_0 : i32, i32
  }
  func.func @transform_4(%arg0: i32) -> (i32, i32) {
    %c0_i32 = arith.constant 0 : i32
    %c0_i32_0 = arith.constant 0 : i32
    return %arg0, %c0_i32 : i32, i32
  }
}

</mosaic_0001>

<bundles_post_ra>
// kernel: tpu_custom_call.1
= control target key start
LH: loop header
LB: loop body
LE: loop exit
PB: predicated region body
PF: predicated region fallthrough
CT: control target
= control target key end

     0   :  { %9 = vsyncpa [#allocation3], 0  ;;  %s6630_s0 = inlined_call_operand.hbm [shape: bf16[32,1024], index: 0, kind: input, shape index: {}]   ;;  %s6631_s1 = inlined_call_operand.hbm [shape: bf16[1024,512], index: 1, kind: input, shape index: {}]   ;;  %s6632_s2 = inlined_call_operand.hbm [shape: bf16[1024,512], index: 2, kind: input, shape index: {}]   ;;  %s6633_s3 = inlined_call_operand.hbm [shape: bf16[512,128], index: 3, kind: input, shape index: {}]   ;;  %s6634_s4 = inlined_call_operand.hbm [shape: f32[32,128], index: 4, kind: output, shape index: {}]  }
   0x1   :  { %11 = vsyncpa [#allocation3 + $0x1], 0 }
   0x2   :  { %12 = vsyncpa [#allocation6], 0 }
   0x3   :  { %13 = vsyncpa [#allocation9], 0 }
   0x4   :  { %14 = vsyncpa [#allocation4], 0 }
   0x5   :  { %16 = vsyncpa [#allocation4 + $0x1], 0  ;;  %s6279_s15 = smov 0   ;;  %s6281_s16 = smov 0  }
   0x6   :  { %s6283_s17 = smov 0   ;;  %s6285_s18 = smov 0  }
   0x7 LB: > { %s6300_s19 = sadd.s32 4294967295, %s6239_s18   ;;  %s4556_s20 = sadd.s32 4294967294, %s6239_s18   ;;  %s6239_s18 = sphi %s6285_s18, %s6658_s18   ;;  %s6235_s17 = sphi %s6283_s17, %s6657_s17   ;;  %s6231_s16 = sphi %s6281_s16, %s6656_s16   ;;  %s6227_s15 = sphi %s6279_s15, %s6655_s15  }
   0x8   : > { %p42_p0 = scmp.ne.s32.totalorder %s6231_s16, %s6227_s15  ;;  %p6635_p1 = scmp.eq.s32.totalorder %s6300_s19, 0 }
   0x9   : > { %p135_p3 = scmp.eq.s32.totalorder %s4556_s20, 1  ;;  %p4557_p5 = scmp.ge.s32.totalorder %s6239_s18, 1 }
   0xa   : > { %p6309_p4 = por %p6635_p1, %p42_p0  ;;  %p142_p7 = scmp.lt.s32.totalorder %s6239_s18, 3 }
   0xb   : > { %p6314_p6 = por %p135_p3, %p42_p0  ;;  %s6241_s24 = smov [#allocation5]  }
   0xc   : > { %s6639_s21 = scalar_select %p6309_p4, 1, 0 }
   0xd   : > { %s6640_s22 = scalar_select %p6314_p6, 1, 0 }
   0xe   : > { %p6319_p8 = pnand %p4557_p5, %p142_p7  ;;  %s154_s25 = sshll.u32 %s6241_s24, 4  ;;  %s155_s25 = int_to_ptr.vmem [resolvable:$true] %s154_s25 }
   0xf   : > { %s6242_s27 = smov [#allocation7]   ;;  %s6243_s29 = smov [#allocation8]  }
  0x10   : > { %s6641_s23 = scalar_select %p6319_p8, 1, 0 }
  0x11   : > { %p5192_p9 = pneg %p6319_p8  ;;  %s167_s28 = sshll.u32 %s6242_s27, 4  ;;  %s168_s28 = int_to_ptr.vmem [resolvable:$true] %s167_s28 }
  0x12   : > { %s180_s30 = sshll.u32 %s6243_s29, 4  ;;  %s6072_s5 = scalar_lea.vmem %s155_s25, 32768  ;;  %s181_s30 = int_to_ptr.vmem [resolvable:$true] %s180_s30 }
  0x13   : > { %p6328_p11 = pnand %p5192_p9, %p6635_p1  ;;  %p6073_p13 = scmp.ne.s32.totalorder %s155_s25, %s6072_s5 }
  0x14   : > { %p6080_p5 = scmp.lt.s32.totalorder %s155_s25, %s155_s25  ;;  %p6081_p7 = scmp.lt.s32.totalorder %s6072_s5, %s6072_s5 }
  0x15   : > { %p6063_p12 = pneg %p6328_p11 }
  0x16   : > { %p6082_p9 = por %p6081_p7, %p6080_p5 }
  0x17   : > { %p6075_p0 = pnand %p6073_p13, %p6063_p12 }
  0x19   : > { %p6076_p3 = pneg %p6075_p0 }
  0x1b   : > { %p6083_p10 = pnand %p6082_p9, %p6076_p3 }
  0x1d   : > { %6086 = shalt.err (!%p6083_p10)
}
  0x1e   : > { %s6244_s6 = smov 256   ;;  %s6245_s7 = smov 16  }
  0x1f   : > { %5195 = dma.hbm_to_vmem [thread:$0]  (!%p6328_p11), %s6631_s1, 32768, %s155_s25, [#allocation6], %s6244_s6, %s6244_s6, %s6245_s7  }
  0x20   : > { %s6098_s10 = scalar_lea.vmem %s168_s28, 32768  ;;  %p6106_p2 = scmp.lt.s32.totalorder %s168_s28, %s168_s28 }
  0x21   : > { %p6099_p1 = scmp.ne.s32.totalorder %s168_s28, %s6098_s10  ;;  %p6107_p6 = scmp.lt.s32.totalorder %s6098_s10, %s6098_s10 }
  0x23   : > { %p6101_p13 = pnand %p6099_p1, %p6063_p12  ;;  %p6108_p5 = por %p6107_p6, %p6106_p2 }
  0x25   : > { %p6102_p0 = pneg %p6101_p13 }
  0x27   : > { %p6109_p3 = pnand %p6108_p5, %p6102_p0 }
  0x29   : > { %6112 = shalt.err (!%p6109_p3)
}
  0x2a   : > { %5198 = dma.hbm_to_vmem [thread:$0]  (!%p6328_p11), %s6632_s2, 32768, %s168_s28, [#allocation6], %s6244_s6, %s6244_s6, %s6245_s7  }
  0x2b   : > { %s6124_s13 = scalar_lea.vmem %s181_s30, 4096  ;;  %p6132_p9 = scmp.lt.s32.totalorder %s181_s30, %s181_s30 }
  0x2c   : > { %p6125_p10 = scmp.ne.s32.totalorder %s181_s30, %s6124_s13  ;;  %p6133_p13 = scmp.lt.s32.totalorder %s6124_s13, %s6124_s13 }
  0x2e   : > { %p6127_p7 = pnand %p6125_p10, %p6063_p12  ;;  %p6134_p4 = por %p6133_p13, %p6132_p9 }
  0x30   : > { %p6128_p1 = pneg %p6127_p7 }
  0x32   : > { %p6135_p2 = pnand %p6134_p4, %p6128_p1 }
  0x34   : > { %6138 = shalt.err (!%p6135_p2)
}
  0x35   : > { %s6246_s14 = smov 64   ;;  %s6247_s20 = smov 4  }
  0x36   : > { %5201 = dma.hbm_to_vmem [thread:$0]  (!%p6328_p11), %s6633_s3, 4096, %s181_s30, [#allocation9], %s6246_s14, %s6246_s14, %s6247_s20  }
  0x37   : > { %s6359_s27 = sadd.s32 1, %s6239_s18   ;;  %s29_s29 = sadd.s32 1, %s6235_s17 }
  0x38   : > { %s26_s28 = ssub.s32 %s6239_s18, %s6359_s27  ;;  %p36_p6 = scmp.ne.s32.totalorder %s6235_s17, %s6231_s16 }
  0x39   : > { %p27_p4 = scmp.eq.s32.totalorder %s26_s28, 0  ;;  %p37_p12 = scmp.eq.s32.totalorder %s6239_s18, 0 }
  0x3a   : > { %p5213_p0 = scmp.lt.s32.totalorder %s6239_s18, 2  ;;  %p6643_p3 = scmp.eq.s32.totalorder %s6300_s19, 1 }
  0x3b   : > { %s6369_s5 = scalar_select %p27_p4, %s6235_s17, %s29_s29  }
  0x3c   : > { %p38_p5 = por %p37_p12, %p36_p6  ;;  %p6373_p10 = por %p6643_p3, %p36_p6 }
  0x3d   : > { %s194_s26 = sand.u32 1, %s6235_s17   ;;  %s5130_s7 = sshll.u32 %s6239_s18, 10 }
  0x3e   : > { %s6644_s6 = scalar_select %p6373_p10, 1, 0 }
  0x3f   : > { %s4562_s30 = sshll.u32 %s194_s26, 6  ;;  %s6382_s10 = scalar_lea.hbm %s6630_s0, %s5130_s7 }
  0x40   : > { %s198_s11 = scalar_lea.vmem [#allocation2], %s4562_s30  ;;  %p6384_p11 = pnand %p5213_p0, %p38_p5 }
  0x41   : > { %s206_s12 = sshll.u32 %s198_s11, 4  ;;  %s6390_s14 = scalar_lea.sflag [#allocation3], %s194_s26  ;;  %s6388_s12 = int_to_ptr.vmem [resolvable:$true] %s206_s12 }
  0x42   : > { %s6139_s20 = scalar_lea.hbm %s6382_s10, 1024  ;;  %p6141_p1 = pneg %p6384_p11 }
  0x43   : > { %p6140_p7 = scmp.ne.s32.totalorder %s6382_s10, %s6139_s20  ;;  %s6144_s28 = scalar_lea.hbm %s6630_s0, 2048 }
  0x44   : > { %p6145_p2 = scmp.lt.s32.totalorder %s6382_s10, %s6630_s0  ;;  %p6146_p4 = scmp.lt.s32.totalorder %s6144_s28, %s6139_s20 }
  0x45   : > { %p6142_p9 = pnand %p6141_p1, %p6140_p7 }
  0x46   : > { %p6147_p6 = por %p6146_p4, %p6145_p2 }
  0x47   : > { %p6143_p13 = pneg %p6142_p9 }
  0x49   : > { %p6148_p12 = pnand %p6147_p6, %p6143_p13 }
  0x4b   : > { %6151 = shalt.err (!%p6148_p12)
}
  0x4c   : > { %s6152_s26 = scalar_lea.vmem %s6388_s12, 1024  ;;  %s6248_s30 = smov [#allocation2]  }
  0x4d   : > { %p6153_p0 = scmp.ne.s32.totalorder %s6388_s12, %s6152_s26  ;;  %s6157_s8 = sshll.u32 %s6248_s30, 4  ;;  %s6158_s8 = int_to_ptr.vmem [resolvable:$false] %s6157_s8 }
  0x4e   : > { %s6159_s9 = scalar_lea.vmem %s6158_s8, 2048  ;;  %p6160_p7 = scmp.lt.s32.totalorder %s6388_s12, %s6158_s8 }
  0x4f   : > { %p6155_p5 = pnand %p6153_p0, %p6141_p1  ;;  %p6161_p9 = scmp.lt.s32.totalorder %s6159_s9, %s6152_s26 }
  0x51   : > { %p6156_p3 = pneg %p6155_p5  ;;  %p6162_p10 = por %p6161_p9, %p6160_p7 }
  0x53   : > { %p6163_p8 = pnand %p6162_p10, %p6156_p3 }
  0x55   : > { %6166 = shalt.err (!%p6163_p8)
}
  0x56   : > { %s6249_s11 = smov 512   ;;  %s6250_s20 = smov 32  }
  0x57   : > { %5205 = dma.hbm_to_vmem [thread:$0]  (!%p6384_p11), %s6382_s10, 1024, %s6388_s12, %s6390_s14, %s6249_s11, %s6249_s11, %s6250_s20  }
  0x58   : > { %p6646_p1 = scmp.ne.s32.totalorder %s6641_s23, 0 }
  0x59   : > { %s6414_s24 = sand.u32 (!%p6646_p1), 1, %s6231_s16   ;;  %p6647_p8 = scmp.ne.s32.totalorder (!%p6646_p1), %s6639_s21, 0 }
  0x5a   : > { %218 = sbr.rel (%p6646_p1) target bundleno = 1042 (0x412), region = 36  ;;  %s4567_s25 = sshll.u32 (!%p6646_p1), %s6414_s24, 6 }
  0x5b   : > { %s221_s28 = scalar_lea.sflag (!%p6646_p1), [#allocation3], %s6414_s24  ;;  %s6418_s29 = scalar_lea.vmem (!%p6646_p1), [#allocation2], %s4567_s25 }
  0x5f   : > { %6210 = dma.done.wait (%p6647_p8), %s221_s28, 1024  }
  0x60   : > { %6212 = vsyncadd (%p6647_p8), %s221_s28, 4294966272  ;;  %p6648_p10 = scmp.eq.s32.totalorder %s6300_s19, 0 }
  0x62   : > { %6214 = dma.done.wait (%p6648_p10), [#allocation6], 65536   ;;  %p6649_p11 = pmov %p6648_p10 }
  0x63   : > { %p6650_p13 = pmov %p6648_p10 }
  0x64   : > { %6216 = vsyncadd (%p6649_p11), [#allocation6], 4294901760 }
  0x65   : > { %6218 = dma.done.wait (%p6650_p13), [#allocation9], 4096   ;;  %p6651_p2 = pmov %p6648_p10 }
  0x66   : > { %v5261_v0 = vld [vmem:[#allocation5 + $0xe4] ss:$16 sps:$4 sm:$0xff]   ;;  %v5265_v2 = vld [vmem:[#allocation5 + $0xe0] ss:$16 sps:$4 sm:$0xff]   ;;  %v265_v50 = vld [vmem:[%s6418_s29 + $0x8] sm:$0xff]  ;;  %s4571_s21 = sshll.u32 %s6414_s24, 4 }
  0x67   : > { %6220 = vsyncadd (%p6651_p2), [#allocation9], 4294963200  ;;  %v5263_v1 = vld [vmem:[#allocation5 + $0x2e4] ss:$16 sps:$4 sm:$0xff]   ;;  %1848 = vmatprep.subr.bf16.mxu0 %v5261_v0  ;;  %v5266_v3 = vld [vmem:[#allocation5 + $0x2e0] ss:$16 sps:$4 sm:$0xff]  }
  0x68   : > { %1891 = vmatprep.subr.bf16.mxu1 %v5263_v1  ;;  %v5267_v4 = vld [vmem:[#allocation5 + $0xc4] ss:$16 sps:$4 sm:$0xff]   ;;  %1849 = vmatpush1.bf16.msra.mxu0 %v5265_v2  ;;  %v5271_v6 = vld [vmem:[#allocation5 + $0xc0] ss:$16 sps:$4 sm:$0xff]   ;;  %v269_v51 = vld [vmem:[%s6418_s29 + $0x28] sm:$0xff]  ;;  %s260_s23 = scalar_lea.vmem [#allocation10], %s4571_s21 }
  0x69   : > { %1892 = vmatpush1.bf16.msra.mxu1 %v5266_v3  ;;  %v5269_v5 = vld [vmem:[#allocation5 + $0x2c4] ss:$16 sps:$4 sm:$0xff]   ;;  %1850 = vmatprep.subr.bf16.mxu0 %v5267_v4  ;;  %v5272_v7 = vld [vmem:[#allocation5 + $0x2c0] ss:$16 sps:$4 sm:$0xff]   ;;  %v6438_v54 = vcombine.high %v265_v50, %v269_v51  ;;  %s4454_s10 = sshll.u32 %s260_s23, 4  ;;  %s5131_s12 = sshll.u32 %s6300_s19, 8  ;;  %s6582_s10 = int_to_ptr.vmem [resolvable:$true] %s4454_s10 }
  0x6a   : > { %1893 = vmatprep.subr.bf16.mxu1 %v5269_v5  ;;  %v5273_v8 = vld [vmem:[#allocation5 + $0xa4] ss:$16 sps:$4 sm:$0xff]   ;;  %v5277_v10 = vld [vmem:[#allocation5 + $0xa0] ss:$16 sps:$4 sm:$0xff]   ;;  %s6587_s7 = scalar_lea.hbm %s6634_s4, %s5131_s12  ;;  %s4441_s26 = scalar_lea.sflag [#allocation4], %s6414_s24 }
  0x6b   : > { %v5275_v9 = vld [vmem:[#allocation5 + $0x2a4] ss:$16 sps:$4 sm:$0xff]   ;;  %v5278_v11 = vld [vmem:[#allocation5 + $0x2a0] ss:$16 sps:$4 sm:$0xff]   ;;  %1923 = vmatprep.mubr.bf16.mxu1 %v6438_v54  ;;  %s6167_s30 = scalar_lea.vmem %s6582_s10, 256  ;;  %p6652_p6 = scmp.ne.s32.totalorder %s6644_s6, 0 }
  0x6c   : > { %1851 = vmatpush1.bf16.msra.mxu0 %v5271_v6  ;;  %v5279_v12 = vld [vmem:[#allocation5 + $0x84] ss:$16 sps:$4 sm:$0xff]   ;;  %v5283_v14 = vld [vmem:[#allocation5 + $0x80] ss:$16 sps:$4 sm:$0xff]   ;;  %p6168_p4 = scmp.ne.s32.totalorder %s6582_s10, %s6167_s30  ;;  %s6251_s19 = smov [#allocation10]  }
  0x6d   : > { %1894 = vmatpush1.bf16.msra.mxu1 %v5272_v7  ;;  %1852 = vmatprep.subr.bf16.mxu0 %v5273_v8  ;;  %v5281_v13 = vld [vmem:[#allocation5 + $0x284] ss:$16 sps:$4 sm:$0xff]   ;;  %v5284_v15 = vld [vmem:[#allocation5 + $0x280] ss:$16 sps:$4 sm:$0xff]   ;;  %s6171_s8 = sshll.u32 %s6251_s19, 4  ;;  %s6172_s8 = int_to_ptr.vmem [resolvable:$false] %s6171_s8 }
  0x6e   : > { %1895 = vmatprep.subr.bf16.mxu1 %v5275_v9  ;;  %v5285_v16 = vld [vmem:[#allocation5 + $0x64] ss:$16 sps:$4 sm:$0xff]   ;;  %v5289_v18 = vld [vmem:[#allocation5 + $0x60] ss:$16 sps:$4 sm:$0xff]   ;;  %v6444_v9 = vcombine.low %v265_v50, %v269_v51  ;;  %p6169_p12 = pnand %p6168_p4, %p6652_p6  ;;  %s6173_s9 = scalar_lea.vmem %s6172_s8, 512 }
  0x6f   : > { %v5287_v17 = vld [vmem:[#allocation5 + $0x264] ss:$16 sps:$4 sm:$0xff]   ;;  %v5290_v19 = vld [vmem:[#allocation5 + $0x260] ss:$16 sps:$4 sm:$0xff]   ;;  %p6174_p5 = scmp.lt.s32.totalorder %s6582_s10, %s6172_s8  ;;  %p6175_p3 = scmp.lt.s32.totalorder %s6173_s9, %s6167_s30 }
  0x70   : > { %1853 = vmatpush1.bf16.msra.mxu0 %v5277_v10  ;;  %v5291_v20 = vld [vmem:[#allocation5 + $0x44] ss:$16 sps:$4 sm:$0xff]   ;;  %v5295_v22 = vld [vmem:[#allocation5 + $0x40] ss:$16 sps:$4 sm:$0xff]   ;;  %p6170_p0 = pneg %p6169_p12 }
  0x71   : > { %1896 = vmatpush1.bf16.msra.mxu1 %v5278_v11  ;;  %1854 = vmatprep.subr.bf16.mxu0 %v5279_v12  ;;  %v5293_v21 = vld [vmem:[#allocation5 + $0x244] ss:$16 sps:$4 sm:$0xff]   ;;  %v5296_v23 = vld [vmem:[#allocation5 + $0x240] ss:$16 sps:$4 sm:$0xff]   ;;  %p6176_p7 = por %p6175_p3, %p6174_p5 }
  0x72   : > { %1897 = vmatprep.subr.bf16.mxu1 %v5281_v13  ;;  %v5297_v24 = vld [vmem:[#allocation5 + $0x24] ss:$16 sps:$4 sm:$0xff]   ;;  %v5301_v26 = vld [vmem:[#allocation5 + $0x20] ss:$16 sps:$4 sm:$0xff]  }
  0x73   : > { %v5299_v25 = vld [vmem:[#allocation5 + $0x224] ss:$16 sps:$4 sm:$0xff]   ;;  %v5302_v27 = vld [vmem:[#allocation5 + $0x220] ss:$16 sps:$4 sm:$0xff]   ;;  %p6177_p9 = pnand %p6176_p7, %p6170_p0 }
  0x74   : > { %1855 = vmatpush1.bf16.msra.mxu0 %v5283_v14  ;;  %v5303_v28 = vld [vmem:[#allocation5 + $0x4] ss:$16 sps:$4 sm:$0xff]   ;;  %v5307_v30 = vld [vmem:[#allocation5] ss:$16 sps:$4 sm:$0xff]  }
  0x75   : > { %1898 = vmatpush1.bf16.msra.mxu1 %v5284_v15  ;;  %1856 = vmatprep.subr.bf16.mxu0 %v5285_v16  ;;  %v5305_v29 = vld [vmem:[#allocation5 + $0x204] ss:$16 sps:$4 sm:$0xff]   ;;  %v5308_v31 = vld [vmem:[#allocation5 + $0x200] ss:$16 sps:$4 sm:$0xff]  }
  0x76   : > { %1899 = vmatprep.subr.bf16.mxu1 %v5287_v17  ;;  %v5309_v32 = vld [vmem:[#allocation5 + $0x1e4] ss:$16 sps:$4 sm:$0xff]   ;;  %v5313_v34 = vld [vmem:[#allocation5 + $0x1e0] ss:$16 sps:$4 sm:$0xff]  }
  0x77   : > { %v5311_v33 = vld [vmem:[#allocation5 + $0x3e4] ss:$16 sps:$4 sm:$0xff]   ;;  %v5314_v35 = vld [vmem:[#allocation5 + $0x3e0] ss:$16 sps:$4 sm:$0xff]  }
  0x78   : > { %1857 = vmatpush1.bf16.msra.mxu0 %v5289_v18  ;;  %v5315_v36 = vld [vmem:[#allocation5 + $0x1c4] ss:$16 sps:$4 sm:$0xff]   ;;  %v5319_v38 = vld [vmem:[#allocation5 + $0x1c0] ss:$16 sps:$4 sm:$0xff]  }
  0x79   : > { %1900 = vmatpush1.bf16.msra.mxu1 %v5290_v19  ;;  %1858 = vmatprep.subr.bf16.mxu0 %v5291_v20  ;;  %v5317_v37 = vld [vmem:[#allocation5 + $0x3c4] ss:$16 sps:$4 sm:$0xff]   ;;  %v5320_v39 = vld [vmem:[#allocation5 + $0x3c0] ss:$16 sps:$4 sm:$0xff]  }
  0x7a   : > { %1901 = vmatprep.subr.bf16.mxu1 %v5293_v21  ;;  %v5321_v40 = vld [vmem:[#allocation5 + $0x1a4] ss:$16 sps:$4 sm:$0xff]   ;;  %v5325_v42 = vld [vmem:[#allocation5 + $0x1a0] ss:$16 sps:$4 sm:$0xff]  }
  0x7b   : > { %v5323_v41 = vld [vmem:[#allocation5 + $0x3a4] ss:$16 sps:$4 sm:$0xff]   ;;  %v5326_v43 = vld [vmem:[#allocation5 + $0x3a0] ss:$16 sps:$4 sm:$0xff]  }
  0x7c   : > { %1859 = vmatpush1.bf16.msra.mxu0 %v5295_v22  ;;  %v5327_v44 = vld [vmem:[#allocation5 + $0x184] ss:$16 sps:$4 sm:$0xff]   ;;  %v5331_v46 = vld [vmem:[#allocation5 + $0x180] ss:$16 sps:$4 sm:$0xff]  }
  0x7d   : > { %1902 = vmatpush1.bf16.msra.mxu1 %v5296_v23  ;;  %1860 = vmatprep.subr.bf16.mxu0 %v5297_v24  ;;  %v5329_v45 = vld [vmem:[#allocation5 + $0x384] ss:$16 sps:$4 sm:$0xff]   ;;  %v5332_v47 = vld [vmem:[#allocation5 + $0x380] ss:$16 sps:$4 sm:$0xff]  }
  0x7e   : > { %1903 = vmatprep.subr.bf16.mxu1 %v5299_v25  ;;  %v264_v48 = vld [vmem:[%s6418_s29] sm:$0xff] }
  0x7f   : > { %v268_v49 = vld [vmem:[%s6418_s29 + $0x20] sm:$0xff] }
  0x80   : > { %1861 = vmatpush1.bf16.msra.mxu0 %v5301_v26  ;;  %v5333_v52 = vld [vmem:[#allocation5 + $0x164] ss:$16 sps:$4 sm:$0xff]   ;;  %v6436_v53 = vcombine.high %v264_v48, %v268_v49  ;;  %v5337_v56 = vld [vmem:[#allocation5 + $0x160] ss:$16 sps:$4 sm:$0xff]   ;;  %v6442_v8 = vcombine.low %v264_v48, %v268_v49 }
  0x81   : > { %1904 = vmatpush1.bf16.msra.mxu1 %v5302_v27  ;;  %1862 = vmatprep.subr.bf16.mxu0 %v5303_v28  ;;  %v5335_v55 = vld [vmem:[#allocation5 + $0x364] ss:$16 sps:$4 sm:$0xff]   ;;  %v5338_v57 = vld [vmem:[#allocation5 + $0x360] ss:$16 sps:$4 sm:$0xff]  }
  0x82   : > { %1905 = vmatprep.subr.bf16.mxu1 %v5305_v29  ;;  %1880 = vmatprep.mubr.bf16.mxu0 %v6436_v53  ;;  %v5339_v58 = vld [vmem:[#allocation5 + $0x144] ss:$16 sps:$4 sm:$0xff]   ;;  %v5343_v60 = vld [vmem:[#allocation5 + $0x140] ss:$16 sps:$4 sm:$0xff]  }
  0x83   : > { %v5341_v59 = vld [vmem:[#allocation5 + $0x344] ss:$16 sps:$4 sm:$0xff]   ;;  %v5344_v61 = vld [vmem:[#allocation5 + $0x340] ss:$16 sps:$4 sm:$0xff]  }
  0x84   : > { %1863 = vmatpush1.bf16.msra.mxu0 %v5307_v30  ;;  %v5345_v62 = vld [vmem:[#allocation5 + $0x124] ss:$16 sps:$4 sm:$0xff]   ;;  %v5349_v0 = vld [vmem:[#allocation5 + $0x120] ss:$16 sps:$4 sm:$0xff]  }
  0x85   : > { %1906 = vmatpush1.bf16.msra.mxu1 %v5308_v31  ;;  %1864 = vmatprep.subr.bf16.mxu0 %v5309_v32  ;;  %v5347_v63 = vld [vmem:[#allocation5 + $0x324] ss:$16 sps:$4 sm:$0xff]   ;;  %v5350_v1 = vld [vmem:[#allocation5 + $0x320] ss:$16 sps:$4 sm:$0xff]  }
  0x86   : > { %1907 = vmatprep.subr.bf16.mxu1 %v5311_v33  ;;  %v5351_v2 = vld [vmem:[#allocation5 + $0x104] ss:$16 sps:$4 sm:$0xff]   ;;  %v5355_v4 = vld [vmem:[#allocation5 + $0x100] ss:$16 sps:$4 sm:$0xff]  }
  0x87   : > { %v5353_v3 = vld [vmem:[#allocation5 + $0x304] ss:$16 sps:$4 sm:$0xff]   ;;  %v5356_v5 = vld [vmem:[#allocation5 + $0x300] ss:$16 sps:$4 sm:$0xff]  }
  0x88   : > { %1865 = vmatpush2.bf16.msra.mxu0 %v5313_v34  ;;  %v5359_v6 = vld [vmem:[#allocation5 + $0x4e4] ss:$16 sps:$4 sm:$0xff]   ;;  %v5357_v10 = vld [vmem:[#allocation5 + $0x4e0] ss:$16 sps:$4 sm:$0xff]  }
  0x89   : > { %1908 = vmatpush2.bf16.msra.mxu1 %v5314_v35  ;;  %1866 = vmatprep.subr.bf16.mxu0 %v5315_v36  ;;  %v5362_v7 = vld [vmem:[#allocation5 + $0x6e4] ss:$16 sps:$4 sm:$0xff]   ;;  %v5360_v11 = vld [vmem:[#allocation5 + $0x6e0] ss:$16 sps:$4 sm:$0xff]  }
  0x8a   : > { %1909 = vmatprep.subr.bf16.mxu1 %v5317_v37  ;;  %v5365_v12 = vld [vmem:[#allocation5 + $0x4c4] ss:$16 sps:$4 sm:$0xff]   ;;  %v5363_v14 = vld [vmem:[#allocation5 + $0x4c0] ss:$16 sps:$4 sm:$0xff]  }
  0x8b   : > { %v5368_v13 = vld [vmem:[#allocation5 + $0x6c4] ss:$16 sps:$4 sm:$0xff]   ;;  %v5366_v15 = vld [vmem:[#allocation5 + $0x6c0] ss:$16 sps:$4 sm:$0xff]  }
  0x8c   : > { %1867 = vmatpush2.bf16.msra.mxu0 %v5319_v38  ;;  %v5371_v16 = vld [vmem:[#allocation5 + $0x4a4] ss:$16 sps:$4 sm:$0xff]   ;;  %v5369_v18 = vld [vmem:[#allocation5 + $0x4a0] ss:$16 sps:$4 sm:$0xff]   ;;  %v6455_v38 = vld [vmem:[%s6418_s29 + $0x18] sm:$0xff] }
  0x8d   : > { %1910 = vmatpush2.bf16.msra.mxu1 %v5320_v39  ;;  %1868 = vmatprep.subr.bf16.mxu0 %v5321_v40  ;;  %v5374_v17 = vld [vmem:[#allocation5 + $0x6a4] ss:$16 sps:$4 sm:$0xff]   ;;  %v5372_v19 = vld [vmem:[#allocation5 + $0x6a0] ss:$16 sps:$4 sm:$0xff]   ;;  %v6458_v39 = vld [vmem:[%s6418_s29 + $0x38] sm:$0xff] }
  0x8e   : > { %1911 = vmatprep.subr.bf16.mxu1 %v5323_v41  ;;  %v5377_v20 = vld [vmem:[#allocation5 + $0x484] ss:$16 sps:$4 sm:$0xff]   ;;  %v5375_v22 = vld [vmem:[#allocation5 + $0x480] ss:$16 sps:$4 sm:$0xff]  }
  0x8f   : > { %v5380_v21 = vld [vmem:[#allocation5 + $0x684] ss:$16 sps:$4 sm:$0xff]   ;;  %v5378_v23 = vld [vmem:[#allocation5 + $0x680] ss:$16 sps:$4 sm:$0xff]  }
  0x90   : > { %1869 = vmatpush2.bf16.msra.mxu0 %v5325_v42  ;;  %v5383_v24 = vld [vmem:[#allocation5 + $0x464] ss:$16 sps:$4 sm:$0xff]   ;;  %v5381_v26 = vld [vmem:[#allocation5 + $0x460] ss:$16 sps:$4 sm:$0xff]   ;;  %v6466_v42 = vcombine.high %v6455_v38, %v6458_v39 }
  0x91   : > { %1912 = vmatpush2.bf16.msra.mxu1 %v5326_v43  ;;  %1870 = vmatprep.subr.bf16.mxu0 %v5327_v44  ;;  %v5386_v25 = vld [vmem:[#allocation5 + $0x664] ss:$16 sps:$4 sm:$0xff]   ;;  %v5384_v27 = vld [vmem:[#allocation5 + $0x660] ss:$16 sps:$4 sm:$0xff]  }
  0x92   : > { %1913 = vmatprep.subr.bf16.mxu1 %v5329_v45  ;;  %v5389_v28 = vld [vmem:[#allocation5 + $0x444] ss:$16 sps:$4 sm:$0xff]   ;;  %v5387_v30 = vld [vmem:[#allocation5 + $0x440] ss:$16 sps:$4 sm:$0xff]  }
  0x93   : > { %v5392_v29 = vld [vmem:[#allocation5 + $0x644] ss:$16 sps:$4 sm:$0xff]   ;;  %v5390_v31 = vld [vmem:[#allocation5 + $0x640] ss:$16 sps:$4 sm:$0xff]  }
  0x94   : > { %1871 = vmatpush2.bf16.msra.mxu0 %v5331_v46  ;;  %v5395_v32 = vld [vmem:[#allocation5 + $0x424] ss:$16 sps:$4 sm:$0xff]   ;;  %v5393_v34 = vld [vmem:[#allocation5 + $0x420] ss:$16 sps:$4 sm:$0xff]  }
  0x95   : > { %1914 = vmatpush2.bf16.msra.mxu1 %v5332_v47  ;;  %1872 = vmatprep.subr.bf16.mxu0 %v5333_v52  ;;  %v5398_v33 = vld [vmem:[#allocation5 + $0x624] ss:$16 sps:$4 sm:$0xff]   ;;  %v5396_v35 = vld [vmem:[#allocation5 + $0x620] ss:$16 sps:$4 sm:$0xff]  }
  0x96   : > { %1915 = vmatprep.subr.bf16.mxu1 %v5335_v55  ;;  %v6449_v36 = vld [vmem:[%s6418_s29 + $0x10] sm:$0xff] }
  0x97   : > { %v6452_v37 = vld [vmem:[%s6418_s29 + $0x30] sm:$0xff] }
  0x98   : > { %1873 = vmatpush2.bf16.msra.mxu0 %v5337_v56  ;;  %v5401_v40 = vld [vmem:[#allocation5 + $0x404] ss:$16 sps:$4 sm:$0xff]   ;;  %v6462_v41 = vcombine.high %v6449_v36, %v6452_v37  ;;  %v5399_v44 = vld [vmem:[#allocation5 + $0x400] ss:$16 sps:$4 sm:$0xff]  }
  0x99   : > { %1916 = vmatpush2.bf16.msra.mxu1 %v5338_v57  ;;  %1874 = vmatprep.subr.bf16.mxu0 %v5339_v58  ;;  %v5404_v43 = vld [vmem:[#allocation5 + $0x604] ss:$16 sps:$4 sm:$0xff]   ;;  %v5402_v45 = vld [vmem:[#allocation5 + $0x600] ss:$16 sps:$4 sm:$0xff]  }
  0x9a   : > { %1917 = vmatprep.subr.bf16.mxu1 %v5341_v59  ;;  %v5407_v46 = vld [vmem:[#allocation5 + $0x5e4] ss:$16 sps:$4 sm:$0xff]   ;;  %v5405_v48 = vld [vmem:[#allocation5 + $0x5e0] ss:$16 sps:$4 sm:$0xff]  }
  0x9b   : > { %v5410_v47 = vld [vmem:[#allocation5 + $0x7e4] ss:$16 sps:$4 sm:$0xff]   ;;  %v5408_v49 = vld [vmem:[#allocation5 + $0x7e0] ss:$16 sps:$4 sm:$0xff]  }
  0x9c   : > { %1875 = vmatpush2.bf16.msra.mxu0 %v5343_v60  ;;  %v5413_v50 = vld [vmem:[#allocation5 + $0x5c4] ss:$16 sps:$4 sm:$0xff]   ;;  %v5411_v52 = vld [vmem:[#allocation5 + $0x5c0] ss:$16 sps:$4 sm:$0xff]  }
  0x9d   : > { %1918 = vmatpush2.bf16.msra.mxu1 %v5344_v61  ;;  %1876 = vmatprep.subr.bf16.mxu0 %v5345_v62  ;;  %v5416_v51 = vld [vmem:[#allocation5 + $0x7c4] ss:$16 sps:$4 sm:$0xff]   ;;  %v5414_v55 = vld [vmem:[#allocation5 + $0x7c0] ss:$16 sps:$4 sm:$0xff]  }
  0x9e   : > { %1919 = vmatprep.subr.bf16.mxu1 %v5347_v63  ;;  %v5419_v56 = vld [vmem:[#allocation5 + $0x5a4] ss:$16 sps:$4 sm:$0xff]   ;;  %v5417_v58 = vld [vmem:[#allocation5 + $0x5a0] ss:$16 sps:$4 sm:$0xff]  }
  0x9f   : > { %v5422_v57 = vld [vmem:[#allocation5 + $0x7a4] ss:$16 sps:$4 sm:$0xff]   ;;  %v5420_v59 = vld [vmem:[#allocation5 + $0x7a0] ss:$16 sps:$4 sm:$0xff]  }
  0xa0   : > { %1877 = vmatpush2.bf16.msra.mxu0 %v5349_v0  ;;  %v5425_v60 = vld [vmem:[#allocation5 + $0x584] ss:$16 sps:$4 sm:$0xff]   ;;  %v5423_v62 = vld [vmem:[#allocation5 + $0x580] ss:$16 sps:$4 sm:$0xff]  }
  0xa1   : > { %1920 = vmatpush2.bf16.msra.mxu1 %v5350_v1  ;;  %1878 = vmatprep.subr.bf16.mxu0 %v5351_v2  ;;  %v5428_v61 = vld [vmem:[#allocation5 + $0x784] ss:$16 sps:$4 sm:$0xff]   ;;  %v5426_v63 = vld [vmem:[#allocation5 + $0x780] ss:$16 sps:$4 sm:$0xff]  }
  0xa2   : > { %1921 = vmatprep.subr.bf16.mxu1 %v5353_v3  ;;  %v5431_v0 = vld [vmem:[#allocation5 + $0x564] ss:$16 sps:$4 sm:$0xff]   ;;  %v5429_v2 = vld [vmem:[#allocation5 + $0x560] ss:$16 sps:$4 sm:$0xff]  }
  0xa3   : > { %v5434_v1 = vld [vmem:[#allocation5 + $0x764] ss:$16 sps:$4 sm:$0xff]   ;;  %v5432_v3 = vld [vmem:[#allocation5 + $0x760] ss:$16 sps:$4 sm:$0xff]  }
  0xa4   : > { %1879 = vmatpush2.bf16.msra.mxu0 %v5355_v4  ;;  %v5437_v4 = vld [vmem:[#allocation5 + $0x544] ss:$16 sps:$4 sm:$0xff]  }
  0xa5   : > { %1922 = vmatpush2.bf16.msra.mxu1 %v5356_v5  ;;  %1934 = vmatprep.subr.bf16.mxu0 %v5359_v6  ;;  %v5440_v5 = vld [vmem:[#allocation5 + $0x744] ss:$16 sps:$4 sm:$0xff]   ;;  %v5435_v6 = vld [vmem:[#allocation5 + $0x540] ss:$16 sps:$4 sm:$0xff]  }
  0xa6   : > { %1977 = vmatprep.subr.bf16.mxu1 %v5362_v7  ;;  %v5438_v7 = vld [vmem:[#allocation5 + $0x740] ss:$16 sps:$4 sm:$0xff]  }
  0xa7   : > { %1881 = vmatmul.mubr.bf16.vlgmr.msra.gmra.mxu0 %v6442_v8 }
  0xa8   : > { %1924 = vmatmul.mubr.bf16.vlgmr.msra.gmra.mxu1 %v6444_v9  ;;  %1935 = vmatpush1.bf16.msra.mxu0 %v5357_v10  ;;  %v5443_v10 = vld [vmem:[#allocation5 + $0x524] ss:$16 sps:$4 sm:$0xff]  }
  0xa9   : > { %1978 = vmatpush1.bf16.msra.mxu1 %v5360_v11  ;;  %1936 = vmatprep.subr.bf16.mxu0 %v5365_v12  ;;  %v5446_v11 = vld [vmem:[#allocation5 + $0x724] ss:$16 sps:$4 sm:$0xff]   ;;  %v5441_v12 = vld [vmem:[#allocation5 + $0x520] ss:$16 sps:$4 sm:$0xff]  }
  0xaa   : > { %1979 = vmatprep.subr.bf16.mxu1 %v5368_v13  ;;  %1966 = vmatprep.mubr.bf16.mxu0 %v6462_v41  ;;  %v5444_v13 = vld [vmem:[#allocation5 + $0x720] ss:$16 sps:$4 sm:$0xff]  }
  0xab   : > { %2009 = vmatprep.mubr.bf16.mxu1 %v6466_v42 }
  0xac   : > { %1937 = vmatpush1.bf16.msra.mxu0 %v5363_v14  ;;  %v5449_v14 = vld [vmem:[#allocation5 + $0x504] ss:$16 sps:$4 sm:$0xff]  }
  0xad   : > { %1980 = vmatpush1.bf16.msra.mxu1 %v5366_v15  ;;  %1938 = vmatprep.subr.bf16.mxu0 %v5371_v16  ;;  %v5452_v15 = vld [vmem:[#allocation5 + $0x704] ss:$16 sps:$4 sm:$0xff]   ;;  %v5447_v16 = vld [vmem:[#allocation5 + $0x500] ss:$16 sps:$4 sm:$0xff]  }
  0xae   : > { %1981 = vmatprep.subr.bf16.mxu1 %v5374_v17  ;;  %v5450_v17 = vld [vmem:[#allocation5 + $0x700] ss:$16 sps:$4 sm:$0xff]  }
  0xb0   : > { %1939 = vmatpush1.bf16.msra.mxu0 %v5369_v18  ;;  %v5455_v18 = vld [vmem:[#allocation5 + $0xec] ss:$16 sps:$4 sm:$0xff]  }
  0xb1   : > { %1982 = vmatpush1.bf16.msra.mxu1 %v5372_v19  ;;  %1940 = vmatprep.subr.bf16.mxu0 %v5377_v20  ;;  %v5458_v19 = vld [vmem:[#allocation5 + $0x2ec] ss:$16 sps:$4 sm:$0xff]   ;;  %v6472_v20 = vcombine.low %v6449_v36, %v6452_v37 }
  0xb2   : > { %1983 = vmatprep.subr.bf16.mxu1 %v5380_v21  ;;  %v6476_v21 = vcombine.low %v6455_v38, %v6458_v39  ;;  %v5479_v36 = vld [vmem:[#allocation5 + $0x6c] ss:$16 sps:$4 sm:$0xff]   ;;  %v5477_v38 = vld [vmem:[#allocation5 + $0x68] ss:$16 sps:$4 sm:$0xff]  }
  0xb3   : > { %v5482_v37 = vld [vmem:[#allocation5 + $0x26c] ss:$16 sps:$4 sm:$0xff]   ;;  %v5480_v39 = vld [vmem:[#allocation5 + $0x268] ss:$16 sps:$4 sm:$0xff]  }
  0xb4   : > { %1941 = vmatpush1.bf16.msra.mxu0 %v5375_v22  ;;  %v5453_v22 = vld [vmem:[#allocation5 + $0xe8] ss:$16 sps:$4 sm:$0xff]  }
  0xb5   : > { %1984 = vmatpush1.bf16.msra.mxu1 %v5378_v23  ;;  %1942 = vmatprep.subr.bf16.mxu0 %v5383_v24  ;;  %v5456_v23 = vld [vmem:[#allocation5 + $0x2e8] ss:$16 sps:$4 sm:$0xff]   ;;  %v5461_v24 = vld [vmem:[#allocation5 + $0xcc] ss:$16 sps:$4 sm:$0xff]  }
  0xb6   : > { %1985 = vmatprep.subr.bf16.mxu1 %v5386_v25  ;;  %v5464_v25 = vld [vmem:[#allocation5 + $0x2cc] ss:$16 sps:$4 sm:$0xff]  }
  0xb8   : > { %1943 = vmatpush1.bf16.msra.mxu0 %v5381_v26  ;;  %v5459_v26 = vld [vmem:[#allocation5 + $0xc8] ss:$16 sps:$4 sm:$0xff]  }
  0xb9   : > { %1986 = vmatpush1.bf16.msra.mxu1 %v5384_v27  ;;  %1944 = vmatprep.subr.bf16.mxu0 %v5389_v28  ;;  %v5462_v27 = vld [vmem:[#allocation5 + $0x2c8] ss:$16 sps:$4 sm:$0xff]   ;;  %v5467_v28 = vld [vmem:[#allocation5 + $0xac] ss:$16 sps:$4 sm:$0xff]  }
  0xba   : > { %1987 = vmatprep.subr.bf16.mxu1 %v5392_v29  ;;  %v5470_v29 = vld [vmem:[#allocation5 + $0x2ac] ss:$16 sps:$4 sm:$0xff]  }
  0xbc   : > { %1945 = vmatpush1.bf16.msra.mxu0 %v5387_v30  ;;  %v5465_v30 = vld [vmem:[#allocation5 + $0xa8] ss:$16 sps:$4 sm:$0xff]  }
  0xbd   : > { %1988 = vmatpush1.bf16.msra.mxu1 %v5390_v31  ;;  %1946 = vmatprep.subr.bf16.mxu0 %v5395_v32  ;;  %v5468_v31 = vld [vmem:[#allocation5 + $0x2a8] ss:$16 sps:$4 sm:$0xff]   ;;  %v5473_v32 = vld [vmem:[#allocation5 + $0x8c] ss:$16 sps:$4 sm:$0xff]  }
  0xbe   : > { %1989 = vmatprep.subr.bf16.mxu1 %v5398_v33  ;;  %v5476_v33 = vld [vmem:[#allocation5 + $0x28c] ss:$16 sps:$4 sm:$0xff]  }
  0xc0   : > { %1947 = vmatpush1.bf16.msra.mxu0 %v5393_v34  ;;  %v5471_v34 = vld [vmem:[#allocation5 + $0x88] ss:$16 sps:$4 sm:$0xff]  }
  0xc1   : > { %1990 = vmatpush1.bf16.msra.mxu1 %v5396_v35  ;;  %1948 = vmatprep.subr.bf16.mxu0 %v5401_v40  ;;  %v5474_v35 = vld [vmem:[#allocation5 + $0x288] ss:$16 sps:$4 sm:$0xff]   ;;  %v5485_v40 = vld [vmem:[#allocation5 + $0x4c] ss:$16 sps:$4 sm:$0xff]  }
  0xc2   : > { %1991 = vmatprep.subr.bf16.mxu1 %v5404_v43  ;;  %v5488_v43 = vld [vmem:[#allocation5 + $0x24c] ss:$16 sps:$4 sm:$0xff]  }
  0xc4   : > { %1949 = vmatpush1.bf16.msra.mxu0 %v5399_v44  ;;  %v5483_v44 = vld [vmem:[#allocation5 + $0x48] ss:$16 sps:$4 sm:$0xff]  }
  0xc5   : > { %1992 = vmatpush1.bf16.msra.mxu1 %v5402_v45  ;;  %1950 = vmatprep.subr.bf16.mxu0 %v5407_v46  ;;  %v5486_v45 = vld [vmem:[#allocation5 + $0x248] ss:$16 sps:$4 sm:$0xff]   ;;  %v5491_v46 = vld [vmem:[#allocation5 + $0x2c] ss:$16 sps:$4 sm:$0xff]  }
  0xc6   : > { %1993 = vmatprep.subr.bf16.mxu1 %v5410_v47  ;;  %v5494_v47 = vld [vmem:[#allocation5 + $0x22c] ss:$16 sps:$4 sm:$0xff]  }
  0xc8   : > { %1951 = vmatpush2.bf16.msra.mxu0 %v5405_v48  ;;  %v5489_v48 = vld [vmem:[#allocation5 + $0x28] ss:$16 sps:$4 sm:$0xff]  }
  0xc9   : > { %1994 = vmatpush2.bf16.msra.mxu1 %v5408_v49  ;;  %1952 = vmatprep.subr.bf16.mxu0 %v5413_v50  ;;  %v5492_v49 = vld [vmem:[#allocation5 + $0x228] ss:$16 sps:$4 sm:$0xff]   ;;  %v5497_v50 = vld [vmem:[#allocation5 + $0xc] ss:$16 sps:$4 sm:$0xff]  }
  0xca   : > { %1995 = vmatprep.subr.bf16.mxu1 %v5416_v51  ;;  %v5500_v51 = vld [vmem:[#allocation5 + $0x20c] ss:$16 sps:$4 sm:$0xff]  }
  0xcc   : > { %1953 = vmatpush2.bf16.msra.mxu0 %v5411_v52  ;;  %v5495_v52 = vld [vmem:[#allocation5 + $0x8] ss:$16 sps:$4 sm:$0xff]  }
  0xcd   : > { %1996 = vmatpush2.bf16.msra.mxu1 %v5414_v55  ;;  %1954 = vmatprep.subr.bf16.mxu0 %v5419_v56  ;;  %v5498_v55 = vld [vmem:[#allocation5 + $0x208] ss:$16 sps:$4 sm:$0xff]   ;;  %v5503_v56 = vld [vmem:[#allocation5 + $0x1ec] ss:$16 sps:$4 sm:$0xff]  }
  0xce   : > { %1997 = vmatprep.subr.bf16.mxu1 %v5422_v57  ;;  %v5506_v57 = vld [vmem:[#allocation5 + $0x3ec] ss:$16 sps:$4 sm:$0xff]  }
  0xd0   : > { %1955 = vmatpush2.bf16.msra.mxu0 %v5417_v58  ;;  %v5501_v58 = vld [vmem:[#allocation5 + $0x1e8] ss:$16 sps:$4 sm:$0xff]  }
  0xd1   : > { %1998 = vmatpush2.bf16.msra.mxu1 %v5420_v59  ;;  %1956 = vmatprep.subr.bf16.mxu0 %v5425_v60  ;;  %v5504_v59 = vld [vmem:[#allocation5 + $0x3e8] ss:$16 sps:$4 sm:$0xff]   ;;  %v5509_v60 = vld [vmem:[#allocation5 + $0x1cc] ss:$16 sps:$4 sm:$0xff]  }
  0xd2   : > { %1999 = vmatprep.subr.bf16.mxu1 %v5428_v61  ;;  %v5512_v61 = vld [vmem:[#allocation5 + $0x3cc] ss:$16 sps:$4 sm:$0xff]  }
  0xd4   : > { %1957 = vmatpush2.bf16.msra.mxu0 %v5423_v62  ;;  %v5507_v62 = vld [vmem:[#allocation5 + $0x1c8] ss:$16 sps:$4 sm:$0xff]  }
  0xd5   : > { %2000 = vmatpush2.bf16.msra.mxu1 %v5426_v63  ;;  %1958 = vmatprep.subr.bf16.mxu0 %v5431_v0  ;;  %v5510_v63 = vld [vmem:[#allocation5 + $0x3c8] ss:$16 sps:$4 sm:$0xff]   ;;  %v5515_v0 = vld [vmem:[#allocation5 + $0x1ac] ss:$16 sps:$4 sm:$0xff]  }
  0xd6   : > { %2001 = vmatprep.subr.bf16.mxu1 %v5434_v1  ;;  %v5518_v1 = vld [vmem:[#allocation5 + $0x3ac] ss:$16 sps:$4 sm:$0xff]  }
  0xd8   : > { %1959 = vmatpush2.bf16.msra.mxu0 %v5429_v2  ;;  %v5513_v2 = vld [vmem:[#allocation5 + $0x1a8] ss:$16 sps:$4 sm:$0xff]  }
  0xd9   : > { %2002 = vmatpush2.bf16.msra.mxu1 %v5432_v3  ;;  %1960 = vmatprep.subr.bf16.mxu0 %v5437_v4  ;;  %v5516_v3 = vld [vmem:[#allocation5 + $0x3a8] ss:$16 sps:$4 sm:$0xff]   ;;  %v5521_v4 = vld [vmem:[#allocation5 + $0x18c] ss:$16 sps:$4 sm:$0xff]  }
  0xda   : > { %2003 = vmatprep.subr.bf16.mxu1 %v5440_v5  ;;  %v5524_v5 = vld [vmem:[#allocation5 + $0x38c] ss:$16 sps:$4 sm:$0xff]  }
  0xdc   : > { %1961 = vmatpush2.bf16.msra.mxu0 %v5435_v6  ;;  %v5519_v6 = vld [vmem:[#allocation5 + $0x188] ss:$16 sps:$4 sm:$0xff]  }
  0xdd   : > { %2004 = vmatpush2.bf16.msra.mxu1 %v5438_v7  ;;  %1962 = vmatprep.subr.bf16.mxu0 %v5443_v10  ;;  %v5522_v7 = vld [vmem:[#allocation5 + $0x388] ss:$16 sps:$4 sm:$0xff]   ;;  %v5527_v10 = vld [vmem:[#allocation5 + $0x16c] ss:$16 sps:$4 sm:$0xff]  }
  0xde   : > { %2005 = vmatprep.subr.bf16.mxu1 %v5446_v11  ;;  %v5530_v11 = vld [vmem:[#allocation5 + $0x36c] ss:$16 sps:$4 sm:$0xff]  }
  0xe0   : > { %1963 = vmatpush2.bf16.msra.mxu0 %v5441_v12  ;;  %v5525_v12 = vld [vmem:[#allocation5 + $0x168] ss:$16 sps:$4 sm:$0xff]  }
  0xe1   : > { %2006 = vmatpush2.bf16.msra.mxu1 %v5444_v13  ;;  %1964 = vmatprep.subr.bf16.mxu0 %v5449_v14  ;;  %v5528_v13 = vld [vmem:[#allocation5 + $0x368] ss:$16 sps:$4 sm:$0xff]   ;;  %v5533_v14 = vld [vmem:[#allocation5 + $0x14c] ss:$16 sps:$4 sm:$0xff]  }
  0xe2   : > { %2007 = vmatprep.subr.bf16.mxu1 %v5452_v15  ;;  %v5536_v15 = vld [vmem:[#allocation5 + $0x34c] ss:$16 sps:$4 sm:$0xff]  }
  0xe4   : > { %1965 = vmatpush2.bf16.msra.mxu0 %v5447_v16  ;;  %v5531_v16 = vld [vmem:[#allocation5 + $0x148] ss:$16 sps:$4 sm:$0xff]  }
  0xe5   : > { %2008 = vmatpush2.bf16.msra.mxu1 %v5450_v17  ;;  %2020 = vmatprep.subr.bf16.mxu0 %v5455_v18  ;;  %v5534_v17 = vld [vmem:[#allocation5 + $0x348] ss:$16 sps:$4 sm:$0xff]   ;;  %v5539_v18 = vld [vmem:[#allocation5 + $0x12c] ss:$16 sps:$4 sm:$0xff]  }
  0xe6   : > { %2063 = vmatprep.subr.bf16.mxu1 %v5458_v19  ;;  %v5542_v19 = vld [vmem:[#allocation5 + $0x32c] ss:$16 sps:$4 sm:$0xff]  }
  0xe7   : > { %1967 = vmatmul.mubr.bf16.vlgmr.msra.gmra.mxu0 %v6472_v20 }
  0xe8   : > { %2010 = vmatmul.mubr.bf16.vlgmr.msra.gmra.mxu1 %v6476_v21  ;;  %2021 = vmatpush1.bf16.msra.mxu0 %v5453_v22  ;;  %v5537_v22 = vld [vmem:[#allocation5 + $0x128] ss:$16 sps:$4 sm:$0xff]  }
  0xe9   : > { %2064 = vmatpush1.bf16.msra.mxu1 %v5456_v23  ;;  %2022 = vmatprep.subr.bf16.mxu0 %v5461_v24  ;;  %v5540_v23 = vld [vmem:[#allocation5 + $0x328] ss:$16 sps:$4 sm:$0xff]   ;;  %v5545_v24 = vld [vmem:[#allocation5 + $0x10c] ss:$16 sps:$4 sm:$0xff]  }
  0xea   : > { %2065 = vmatprep.subr.bf16.mxu1 %v5464_v25  ;;  %2052 = vmatprep.mubr.bf16.mxu0 %v6436_v53  ;;  %v5548_v25 = vld [vmem:[#allocation5 + $0x30c] ss:$16 sps:$4 sm:$0xff]  }
  0xeb   : > { %2095 = vmatprep.mubr.bf16.mxu1 %v6438_v54 }
  0xec   : > { %2023 = vmatpush1.bf16.msra.mxu0 %v5459_v26  ;;  %v5543_v26 = vld [vmem:[#allocation5 + $0x108] ss:$16 sps:$4 sm:$0xff]  }
  0xed   : > { %2066 = vmatpush1.bf16.msra.mxu1 %v5462_v27  ;;  %2024 = vmatprep.subr.bf16.mxu0 %v5467_v28  ;;  %v5546_v27 = vld [vmem:[#allocation5 + $0x308] ss:$16 sps:$4 sm:$0xff]   ;;  %v5551_v28 = vld [vmem:[#allocation5 + $0x4ec] ss:$16 sps:$4 sm:$0xff]  }
  0xee   : > { %2067 = vmatprep.subr.bf16.mxu1 %v5470_v29  ;;  %v5554_v29 = vld [vmem:[#allocation5 + $0x6ec] ss:$16 sps:$4 sm:$0xff]  }
  0xf0   : > { %2025 = vmatpush1.bf16.msra.mxu0 %v5465_v30  ;;  %v5549_v30 = vld [vmem:[#allocation5 + $0x4e8] ss:$16 sps:$4 sm:$0xff]  }
  0xf1   : > { %2068 = vmatpush1.bf16.msra.mxu1 %v5468_v31  ;;  %2026 = vmatprep.subr.bf16.mxu0 %v5473_v32  ;;  %v5552_v31 = vld [vmem:[#allocation5 + $0x6e8] ss:$16 sps:$4 sm:$0xff]   ;;  %v5557_v32 = vld [vmem:[#allocation5 + $0x4cc] ss:$16 sps:$4 sm:$0xff]  }
  0xf2   : > { %2069 = vmatprep.subr.bf16.mxu1 %v5476_v33  ;;  %v5560_v33 = vld [vmem:[#allocation5 + $0x6cc] ss:$16 sps:$4 sm:$0xff]  }
  0xf4   : > { %2027 = vmatpush1.bf16.msra.mxu0 %v5471_v34  ;;  %v5555_v34 = vld [vmem:[#allocation5 + $0x4c8] ss:$16 sps:$4 sm:$0xff]  }
  0xf5   : > { %2070 = vmatpush1.bf16.msra.mxu1 %v5474_v35  ;;  %2028 = vmatprep.subr.bf16.mxu0 %v5479_v36  ;;  %v5558_v35 = vld [vmem:[#allocation5 + $0x6c8] ss:$16 sps:$4 sm:$0xff]   ;;  %v5563_v36 = vld [vmem:[#allocation5 + $0x4ac] ss:$16 sps:$4 sm:$0xff]  }
  0xf6   : > { %2071 = vmatprep.subr.bf16.mxu1 %v5482_v37  ;;  %v5566_v37 = vld [vmem:[#allocation5 + $0x6ac] ss:$16 sps:$4 sm:$0xff]  }
  0xf8   : > { %2029 = vmatpush1.bf16.msra.mxu0 %v5477_v38  ;;  %v5561_v38 = vld [vmem:[#allocation5 + $0x4a8] ss:$16 sps:$4 sm:$0xff]  }
  0xf9   : > { %2072 = vmatpush1.bf16.msra.mxu1 %v5480_v39  ;;  %2030 = vmatprep.subr.bf16.mxu0 %v5485_v40  ;;  %v5564_v39 = vld [vmem:[#allocation5 + $0x6a8] ss:$16 sps:$4 sm:$0xff]   ;;  %v5569_v40 = vld [vmem:[#allocation5 + $0x48c] ss:$16 sps:$4 sm:$0xff]  }
  0xfa   : > { %2073 = vmatprep.subr.bf16.mxu1 %v5488_v43  ;;  %v5572_v43 = vld [vmem:[#allocation5 + $0x68c] ss:$16 sps:$4 sm:$0xff]  }
  0xfc   : > { %2031 = vmatpush1.bf16.msra.mxu0 %v5483_v44  ;;  %v5567_v44 = vld [vmem:[#allocation5 + $0x488] ss:$16 sps:$4 sm:$0xff]  }
  0xfd   : > { %2074 = vmatpush1.bf16.msra.mxu1 %v5486_v45  ;;  %2032 = vmatprep.subr.bf16.mxu0 %v5491_v46  ;;  %v5570_v45 = vld [vmem:[#allocation5 + $0x688] ss:$16 sps:$4 sm:$0xff]   ;;  %v5575_v46 = vld [vmem:[#allocation5 + $0x46c] ss:$16 sps:$4 sm:$0xff]  }
  0xfe   : > { %2075 = vmatprep.subr.bf16.mxu1 %v5494_v47  ;;  %v5578_v47 = vld [vmem:[#allocation5 + $0x66c] ss:$16 sps:$4 sm:$0xff]  }
 0x100   : > { %2033 = vmatpush1.bf16.msra.mxu0 %v5489_v48  ;;  %v5573_v48 = vld [vmem:[#allocation5 + $0x468] ss:$16 sps:$4 sm:$0xff]  }
 0x101   : > { %2076 = vmatpush1.bf16.msra.mxu1 %v5492_v49  ;;  %2034 = vmatprep.subr.bf16.mxu0 %v5497_v50  ;;  %v5576_v49 = vld [vmem:[#allocation5 + $0x668] ss:$16 sps:$4 sm:$0xff]   ;;  %v5581_v50 = vld [vmem:[#allocation5 + $0x44c] ss:$16 sps:$4 sm:$0xff]  }
 0x102   : > { %2077 = vmatprep.subr.bf16.mxu1 %v5500_v51  ;;  %v5584_v51 = vld [vmem:[#allocation5 + $0x64c] ss:$16 sps:$4 sm:$0xff]  }
 0x104   : > { %2035 = vmatpush1.bf16.msra.mxu0 %v5495_v52  ;;  %v5579_v52 = vld [vmem:[#allocation5 + $0x448] ss:$16 sps:$4 sm:$0xff]  }
 0x105   : > { %2078 = vmatpush1.bf16.msra.mxu1 %v5498_v55  ;;  %2036 = vmatprep.subr.bf16.mxu0 %v5503_v56  ;;  %v5582_v55 = vld [vmem:[#allocation5 + $0x648] ss:$16 sps:$4 sm:$0xff]   ;;  %v5587_v56 = vld [vmem:[#allocation5 + $0x42c] ss:$16 sps:$4 sm:$0xff]  }
 0x106   : > { %2079 = vmatprep.subr.bf16.mxu1 %v5506_v57  ;;  %v5590_v57 = vld [vmem:[#allocation5 + $0x62c] ss:$16 sps:$4 sm:$0xff]  }
 0x108   : > { %2037 = vmatpush2.bf16.msra.mxu0 %v5501_v58  ;;  %v5585_v58 = vld [vmem:[#allocation5 + $0x428] ss:$16 sps:$4 sm:$0xff]  }
 0x109   : > { %2080 = vmatpush2.bf16.msra.mxu1 %v5504_v59  ;;  %2038 = vmatprep.subr.bf16.mxu0 %v5509_v60  ;;  %v5588_v59 = vld [vmem:[#allocation5 + $0x628] ss:$16 sps:$4 sm:$0xff]   ;;  %v5593_v60 = vld [vmem:[#allocation5 + $0x40c] ss:$16 sps:$4 sm:$0xff]  }
 0x10a   : > { %2081 = vmatprep.subr.bf16.mxu1 %v5512_v61  ;;  %v5596_v61 = vld [vmem:[#allocation5 + $0x60c] ss:$16 sps:$4 sm:$0xff]  }
 0x10c   : > { %2039 = vmatpush2.bf16.msra.mxu0 %v5507_v62  ;;  %v5591_v62 = vld [vmem:[#allocation5 + $0x408] ss:$16 sps:$4 sm:$0xff]  }
 0x10d   : > { %2082 = vmatpush2.bf16.msra.mxu1 %v5510_v63  ;;  %2040 = vmatprep.subr.bf16.mxu0 %v5515_v0  ;;  %v5594_v63 = vld [vmem:[#allocation5 + $0x608] ss:$16 sps:$4 sm:$0xff]   ;;  %v5599_v0 = vld [vmem:[#allocation5 + $0x5ec] ss:$16 sps:$4 sm:$0xff]  }
 0x10e   : > { %2083 = vmatprep.subr.bf16.mxu1 %v5518_v1  ;;  %v5602_v1 = vld [vmem:[#allocation5 + $0x7ec] ss:$16 sps:$4 sm:$0xff]  }
 0x110   : > { %2041 = vmatpush2.bf16.msra.mxu0 %v5513_v2  ;;  %v5597_v2 = vld [vmem:[#allocation5 + $0x5e8] ss:$16 sps:$4 sm:$0xff]  }
 0x111   : > { %2084 = vmatpush2.bf16.msra.mxu1 %v5516_v3  ;;  %2042 = vmatprep.subr.bf16.mxu0 %v5521_v4  ;;  %v5600_v3 = vld [vmem:[#allocation5 + $0x7e8] ss:$16 sps:$4 sm:$0xff]   ;;  %v5605_v4 = vld [vmem:[#allocation5 + $0x5cc] ss:$16 sps:$4 sm:$0xff]  }
 0x112   : > { %2085 = vmatprep.subr.bf16.mxu1 %v5524_v5  ;;  %v5608_v5 = vld [vmem:[#allocation5 + $0x7cc] ss:$16 sps:$4 sm:$0xff]  }
 0x114   : > { %2043 = vmatpush2.bf16.msra.mxu0 %v5519_v6  ;;  %v5603_v6 = vld [vmem:[#allocation5 + $0x5c8] ss:$16 sps:$4 sm:$0xff]  }
 0x115   : > { %2086 = vmatpush2.bf16.msra.mxu1 %v5522_v7  ;;  %2044 = vmatprep.subr.bf16.mxu0 %v5527_v10  ;;  %v5606_v7 = vld [vmem:[#allocation5 + $0x7c8] ss:$16 sps:$4 sm:$0xff]   ;;  %v5611_v10 = vld [vmem:[#allocation5 + $0x5ac] ss:$16 sps:$4 sm:$0xff]  }
 0x116   : > { %2087 = vmatprep.subr.bf16.mxu1 %v5530_v11  ;;  %v5614_v11 = vld [vmem:[#allocation5 + $0x7ac] ss:$16 sps:$4 sm:$0xff]  }
 0x118   : > { %2045 = vmatpush2.bf16.msra.mxu0 %v5525_v12  ;;  %v5609_v12 = vld [vmem:[#allocation5 + $0x5a8] ss:$16 sps:$4 sm:$0xff]  }
 0x119   : > { %2088 = vmatpush2.bf16.msra.mxu1 %v5528_v13  ;;  %2046 = vmatprep.subr.bf16.mxu0 %v5533_v14  ;;  %v5612_v13 = vld [vmem:[#allocation5 + $0x7a8] ss:$16 sps:$4 sm:$0xff]   ;;  %v5617_v14 = vld [vmem:[#allocation5 + $0x58c] ss:$16 sps:$4 sm:$0xff]  }
 0x11a   : > { %2089 = vmatprep.subr.bf16.mxu1 %v5536_v15  ;;  %v5620_v15 = vld [vmem:[#allocation5 + $0x78c] ss:$16 sps:$4 sm:$0xff]  }
 0x11c   : > { %2047 = vmatpush2.bf16.msra.mxu0 %v5531_v16  ;;  %v5615_v16 = vld [vmem:[#allocation5 + $0x588] ss:$16 sps:$4 sm:$0xff]  }
 0x11d   : > { %2090 = vmatpush2.bf16.msra.mxu1 %v5534_v17  ;;  %2048 = vmatprep.subr.bf16.mxu0 %v5539_v18  ;;  %v5618_v17 = vld [vmem:[#allocation5 + $0x788] ss:$16 sps:$4 sm:$0xff]   ;;  %v5623_v18 = vld [vmem:[#allocation5 + $0x56c] ss:$16 sps:$4 sm:$0xff]  }
 0x11e   : > { %2091 = vmatprep.subr.bf16.mxu1 %v5542_v19  ;;  %v5626_v19 = vld [vmem:[#allocation5 + $0x76c] ss:$16 sps:$4 sm:$0xff]  }
 0x120   : > { %2049 = vmatpush2.bf16.msra.mxu0 %v5537_v22  ;;  %v5621_v22 = vld [vmem:[#allocation5 + $0x568] ss:$16 sps:$4 sm:$0xff]  }
 0x121   : > { %2092 = vmatpush2.bf16.msra.mxu1 %v5540_v23  ;;  %2050 = vmatprep.subr.bf16.mxu0 %v5545_v24  ;;  %v5624_v23 = vld [vmem:[#allocation5 + $0x768] ss:$16 sps:$4 sm:$0xff]   ;;  %v5629_v24 = vld [vmem:[#allocation5 + $0x54c] ss:$16 sps:$4 sm:$0xff]  }
 0x122   : > { %2093 = vmatprep.subr.bf16.mxu1 %v5548_v25  ;;  %v5632_v25 = vld [vmem:[#allocation5 + $0x74c] ss:$16 sps:$4 sm:$0xff]  }
 0x124   : > { %2051 = vmatpush2.bf16.msra.mxu0 %v5543_v26  ;;  %v5627_v26 = vld [vmem:[#allocation5 + $0x548] ss:$16 sps:$4 sm:$0xff]  }
 0x125   : > { %2094 = vmatpush2.bf16.msra.mxu1 %v5546_v27  ;;  %2106 = vmatprep.subr.bf16.mxu0 %v5551_v28  ;;  %v5630_v27 = vld [vmem:[#allocation5 + $0x748] ss:$16 sps:$4 sm:$0xff]   ;;  %v5635_v28 = vld [vmem:[#allocation5 + $0x52c] ss:$16 sps:$4 sm:$0xff]  }
 0x126   : > { %2149 = vmatprep.subr.bf16.mxu1 %v5554_v29  ;;  %v5638_v29 = vld [vmem:[#allocation5 + $0x72c] ss:$16 sps:$4 sm:$0xff]  }
 0x127   : > { %2053 = vmatmul.mubr.bf16.vlgmr.msra.gmra.mxu0 %v6442_v8 }
 0x128   : > { %2096 = vmatmul.mubr.bf16.vlgmr.msra.gmra.mxu1 %v6444_v9  ;;  %2107 = vmatpush1.bf16.msra.mxu0 %v5549_v30  ;;  %v5633_v30 = vld [vmem:[#allocation5 + $0x528] ss:$16 sps:$4 sm:$0xff]  }
 0x129   : > { %2150 = vmatpush1.bf16.msra.mxu1 %v5552_v31  ;;  %2108 = vmatprep.subr.bf16.mxu0 %v5557_v32  ;;  %v5636_v31 = vld [vmem:[#allocation5 + $0x728] ss:$16 sps:$4 sm:$0xff]   ;;  %v5641_v32 = vld [vmem:[#allocation5 + $0x50c] ss:$16 sps:$4 sm:$0xff]  }
 0x12a   : > { %2151 = vmatprep.subr.bf16.mxu1 %v5560_v33  ;;  %2138 = vmatprep.mubr.bf16.mxu0 %v6462_v41  ;;  %v5644_v33 = vld [vmem:[#allocation5 + $0x70c] ss:$16 sps:$4 sm:$0xff]  }
 0x12b   : > { %2181 = vmatprep.mubr.bf16.mxu1 %v6466_v42 }
 0x12c   : > { %2109 = vmatpush1.bf16.msra.mxu0 %v5555_v34  ;;  %v5639_v34 = vld [vmem:[#allocation5 + $0x508] ss:$16 sps:$4 sm:$0xff]  }
 0x12d   : > { %2152 = vmatpush1.bf16.msra.mxu1 %v5558_v35  ;;  %2110 = vmatprep.subr.bf16.mxu0 %v5563_v36  ;;  %v5642_v35 = vld [vmem:[#allocation5 + $0x708] ss:$16 sps:$4 sm:$0xff]   ;;  %v5647_v36 = vld [vmem:[#allocation7 + $0xe4] ss:$16 sps:$4 sm:$0xff]  }
 0x12e   : > { %2153 = vmatprep.subr.bf16.mxu1 %v5566_v37  ;;  %v5650_v37 = vld [vmem:[#allocation7 + $0x2e4] ss:$16 sps:$4 sm:$0xff]  }
 0x130   : > { %2111 = vmatpush1.bf16.msra.mxu0 %v5561_v38  ;;  %v5645_v38 = vld [vmem:[#allocation7 + $0xe0] ss:$16 sps:$4 sm:$0xff]  }
 0x131   : > { %2154 = vmatpush1.bf16.msra.mxu1 %v5564_v39  ;;  %2112 = vmatprep.subr.bf16.mxu0 %v5569_v40  ;;  %v5648_v39 = vld [vmem:[#allocation7 + $0x2e0] ss:$16 sps:$4 sm:$0xff]   ;;  %v5653_v40 = vld [vmem:[#allocation7 + $0xc4] ss:$16 sps:$4 sm:$0xff]  }
 0x132   : > { %2155 = vmatprep.subr.bf16.mxu1 %v5572_v43  ;;  %v5656_v43 = vld [vmem:[#allocation7 + $0x2c4] ss:$16 sps:$4 sm:$0xff]  }
 0x134   : > { %2113 = vmatpush1.bf16.msra.mxu0 %v5567_v44  ;;  %v5651_v44 = vld [vmem:[#allocation7 + $0xc0] ss:$16 sps:$4 sm:$0xff]  }
 0x135   : > { %2156 = vmatpush1.bf16.msra.mxu1 %v5570_v45  ;;  %2114 = vmatprep.subr.bf16.mxu0 %v5575_v46  ;;  %v5654_v45 = vld [vmem:[#allocation7 + $0x2c0] ss:$16 sps:$4 sm:$0xff]   ;;  %v5659_v46 = vld [vmem:[#allocation7 + $0xa4] ss:$16 sps:$4 sm:$0xff]  }
 0x136   : > { %2157 = vmatprep.subr.bf16.mxu1 %v5578_v47  ;;  %v5662_v47 = vld [vmem:[#allocation7 + $0x2a4] ss:$16 sps:$4 sm:$0xff]  }
 0x138   : > { %2115 = vmatpush1.bf16.msra.mxu0 %v5573_v48  ;;  %v5657_v48 = vld [vmem:[#allocation7 + $0xa0] ss:$16 sps:$4 sm:$0xff]  }
 0x139   : > { %2158 = vmatpush1.bf16.msra.mxu1 %v5576_v49  ;;  %2116 = vmatprep.subr.bf16.mxu0 %v5581_v50  ;;  %v5660_v49 = vld [vmem:[#allocation7 + $0x2a0] ss:$16 sps:$4 sm:$0xff]   ;;  %v5665_v50 = vld [vmem:[#allocation7 + $0x84] ss:$16 sps:$4 sm:$0xff]  }
 0x13a   : > { %2159 = vmatprep.subr.bf16.mxu1 %v5584_v51  ;;  %v5668_v51 = vld [vmem:[#allocation7 + $0x284] ss:$16 sps:$4 sm:$0xff]  }
 0x13c   : > { %2117 = vmatpush1.bf16.msra.mxu0 %v5579_v52  ;;  %v5663_v52 = vld [vmem:[#allocation7 + $0x80] ss:$16 sps:$4 sm:$0xff]  }
 0x13d   : > { %2160 = vmatpush1.bf16.msra.mxu1 %v5582_v55  ;;  %2118 = vmatprep.subr.bf16.mxu0 %v5587_v56  ;;  %v5666_v55 = vld [vmem:[#allocation7 + $0x280] ss:$16 sps:$4 sm:$0xff]   ;;  %v5671_v56 = vld [vmem:[#allocation7 + $0x64] ss:$16 sps:$4 sm:$0xff]  }
 0x13e   : > { %2161 = vmatprep.subr.bf16.mxu1 %v5590_v57  ;;  %v5674_v57 = vld [vmem:[#allocation7 + $0x264] ss:$16 sps:$4 sm:$0xff]  }
 0x140   : > { %2119 = vmatpush1.bf16.msra.mxu0 %v5585_v58  ;;  %v5669_v58 = vld [vmem:[#allocation7 + $0x60] ss:$16 sps:$4 sm:$0xff]  }
 0x141   : > { %2162 = vmatpush1.bf16.msra.mxu1 %v5588_v59  ;;  %2120 = vmatprep.subr.bf16.mxu0 %v5593_v60  ;;  %v5672_v59 = vld [vmem:[#allocation7 + $0x260] ss:$16 sps:$4 sm:$0xff]   ;;  %v5677_v60 = vld [vmem:[#allocation7 + $0x44] ss:$16 sps:$4 sm:$0xff]  }
 0x142   : > { %2163 = vmatprep.subr.bf16.mxu1 %v5596_v61  ;;  %v5680_v61 = vld [vmem:[#allocation7 + $0x244] ss:$16 sps:$4 sm:$0xff]  }
 0x144   : > { %2121 = vmatpush1.bf16.msra.mxu0 %v5591_v62  ;;  %v5675_v62 = vld [vmem:[#allocation7 + $0x40] ss:$16 sps:$4 sm:$0xff]  }
 0x145   : > { %2164 = vmatpush1.bf16.msra.mxu1 %v5594_v63  ;;  %2122 = vmatprep.subr.bf16.mxu0 %v5599_v0  ;;  %v5678_v63 = vld [vmem:[#allocation7 + $0x240] ss:$16 sps:$4 sm:$0xff]   ;;  %v5683_v0 = vld [vmem:[#allocation7 + $0x24] ss:$16 sps:$4 sm:$0xff]  }
 0x146   : > { %2165 = vmatprep.subr.bf16.mxu1 %v5602_v1  ;;  %v5686_v1 = vld [vmem:[#allocation7 + $0x224] ss:$16 sps:$4 sm:$0xff]  }
 0x148   : > { %2123 = vmatpush2.bf16.msra.mxu0 %v5597_v2  ;;  %v5681_v2 = vld [vmem:[#allocation7 + $0x20] ss:$16 sps:$4 sm:$0xff]  }
 0x149   : > { %2166 = vmatpush2.bf16.msra.mxu1 %v5600_v3  ;;  %2124 = vmatprep.subr.bf16.mxu0 %v5605_v4  ;;  %v5684_v3 = vld [vmem:[#allocation7 + $0x220] ss:$16 sps:$4 sm:$0xff]   ;;  %v5689_v4 = vld [vmem:[#allocation7 + $0x4] ss:$16 sps:$4 sm:$0xff]  }
 0x14a   : > { %2167 = vmatprep.subr.bf16.mxu1 %v5608_v5  ;;  %v5692_v5 = vld [vmem:[#allocation7 + $0x204] ss:$16 sps:$4 sm:$0xff]  }
 0x14c   : > { %2125 = vmatpush2.bf16.msra.mxu0 %v5603_v6  ;;  %v5687_v6 = vld [vmem:[#allocation7] ss:$16 sps:$4 sm:$0xff]  }
 0x14d   : > { %2168 = vmatpush2.bf16.msra.mxu1 %v5606_v7  ;;  %2126 = vmatprep.subr.bf16.mxu0 %v5611_v10  ;;  %v5690_v7 = vld [vmem:[#allocation7 + $0x200] ss:$16 sps:$4 sm:$0xff]   ;;  %v5695_v10 = vld [vmem:[#allocation7 + $0x1e4] ss:$16 sps:$4 sm:$0xff]  }
 0x14e   : > { %2169 = vmatprep.subr.bf16.mxu1 %v5614_v11  ;;  %v5698_v11 = vld [vmem:[#allocation7 + $0x3e4] ss:$16 sps:$4 sm:$0xff]  }
 0x150   : > { %2127 = vmatpush2.bf16.msra.mxu0 %v5609_v12  ;;  %v5693_v12 = vld [vmem:[#allocation7 + $0x1e0] ss:$16 sps:$4 sm:$0xff]  }
 0x151   : > { %2170 = vmatpush2.bf16.msra.mxu1 %v5612_v13  ;;  %2128 = vmatprep.subr.bf16.mxu0 %v5617_v14  ;;  %v5696_v13 = vld [vmem:[#allocation7 + $0x3e0] ss:$16 sps:$4 sm:$0xff]   ;;  %v5701_v14 = vld [vmem:[#allocation7 + $0x1c4] ss:$16 sps:$4 sm:$0xff]  }
 0x152   : > { %2171 = vmatprep.subr.bf16.mxu1 %v5620_v15  ;;  %v5704_v15 = vld [vmem:[#allocation7 + $0x3c4] ss:$16 sps:$4 sm:$0xff]  }
 0x154   : > { %2129 = vmatpush2.bf16.msra.mxu0 %v5615_v16  ;;  %v5699_v16 = vld [vmem:[#allocation7 + $0x1c0] ss:$16 sps:$4 sm:$0xff]  }
 0x155   : > { %2172 = vmatpush2.bf16.msra.mxu1 %v5618_v17  ;;  %2130 = vmatprep.subr.bf16.mxu0 %v5623_v18  ;;  %v5702_v17 = vld [vmem:[#allocation7 + $0x3c0] ss:$16 sps:$4 sm:$0xff]   ;;  %v5707_v18 = vld [vmem:[#allocation7 + $0x1a4] ss:$16 sps:$4 sm:$0xff]  }
 0x156   : > { %2173 = vmatprep.subr.bf16.mxu1 %v5626_v19  ;;  %v5710_v19 = vld [vmem:[#allocation7 + $0x3a4] ss:$16 sps:$4 sm:$0xff]  }
 0x158   : > { %2131 = vmatpush2.bf16.msra.mxu0 %v5621_v22  ;;  %v5705_v22 = vld [vmem:[#allocation7 + $0x1a0] ss:$16 sps:$4 sm:$0xff]  }
 0x159   : > { %2174 = vmatpush2.bf16.msra.mxu1 %v5624_v23  ;;  %2132 = vmatprep.subr.bf16.mxu0 %v5629_v24  ;;  %v5708_v23 = vld [vmem:[#allocation7 + $0x3a0] ss:$16 sps:$4 sm:$0xff]   ;;  %v5713_v24 = vld [vmem:[#allocation7 + $0x184] ss:$16 sps:$4 sm:$0xff]  }
 0x15a   : > { %2175 = vmatprep.subr.bf16.mxu1 %v5632_v25  ;;  %v5716_v25 = vld [vmem:[#allocation7 + $0x384] ss:$16 sps:$4 sm:$0xff]  }
 0x15c   : > { %2133 = vmatpush2.bf16.msra.mxu0 %v5627_v26  ;;  %v5711_v26 = vld [vmem:[#allocation7 + $0x180] ss:$16 sps:$4 sm:$0xff]  }
 0x15d   : > { %2176 = vmatpush2.bf16.msra.mxu1 %v5630_v27  ;;  %2134 = vmatprep.subr.bf16.mxu0 %v5635_v28  ;;  %v5714_v27 = vld [vmem:[#allocation7 + $0x380] ss:$16 sps:$4 sm:$0xff]   ;;  %v5719_v28 = vld [vmem:[#allocation7 + $0x164] ss:$16 sps:$4 sm:$0xff]  }
 0x15e   : > { %2177 = vmatprep.subr.bf16.mxu1 %v5638_v29  ;;  %v5722_v29 = vld [vmem:[#allocation7 + $0x364] ss:$16 sps:$4 sm:$0xff]  }
 0x160   : > { %2135 = vmatpush2.bf16.msra.mxu0 %v5633_v30  ;;  %v5717_v30 = vld [vmem:[#allocation7 + $0x160] ss:$16 sps:$4 sm:$0xff]  }
 0x161   : > { %2178 = vmatpush2.bf16.msra.mxu1 %v5636_v31  ;;  %2136 = vmatprep.subr.bf16.mxu0 %v5641_v32  ;;  %v5720_v31 = vld [vmem:[#allocation7 + $0x360] ss:$16 sps:$4 sm:$0xff]   ;;  %v5725_v32 = vld [vmem:[#allocation7 + $0x144] ss:$16 sps:$4 sm:$0xff]  }
 0x162   : > { %2179 = vmatprep.subr.bf16.mxu1 %v5644_v33  ;;  %v5728_v33 = vld [vmem:[#allocation7 + $0x344] ss:$16 sps:$4 sm:$0xff]  }
 0x164   : > { %2137 = vmatpush2.bf16.msra.mxu0 %v5639_v34  ;;  %v5723_v34 = vld [vmem:[#allocation7 + $0x140] ss:$16 sps:$4 sm:$0xff]  }
 0x165   : > { %2180 = vmatpush2.bf16.msra.mxu1 %v5642_v35  ;;  %3728 = vmatprep.subr.bf16.mxu0 %v5647_v36  ;;  %v5726_v35 = vld [vmem:[#allocation7 + $0x340] ss:$16 sps:$4 sm:$0xff]   ;;  %v5731_v36 = vld [vmem:[#allocation7 + $0x124] ss:$16 sps:$4 sm:$0xff]  }
 0x166   : > { %3771 = vmatprep.subr.bf16.mxu1 %v5650_v37  ;;  %v5734_v37 = vld [vmem:[#allocation7 + $0x324] ss:$16 sps:$4 sm:$0xff]  }
 0x167   : > { %2139 = vmatmul.mubr.bf16.vlgmr.msra.gmra.mxu0 %v6472_v20 }
 0x168   : > { %2182 = vmatmul.mubr.bf16.vlgmr.msra.gmra.mxu1 %v6476_v21  ;;  %3729 = vmatpush1.bf16.msra.mxu0 %v5645_v38  ;;  %v5729_v38 = vld [vmem:[#allocation7 + $0x120] ss:$16 sps:$4 sm:$0xff]  }
 0x169   : > { %3772 = vmatpush1.bf16.msra.mxu1 %v5648_v39  ;;  %3730 = vmatprep.subr.bf16.mxu0 %v5653_v40  ;;  %v5732_v39 = vld [vmem:[#allocation7 + $0x320] ss:$16 sps:$4 sm:$0xff]   ;;  %v5737_v40 = vld [vmem:[#allocation7 + $0x104] ss:$16 sps:$4 sm:$0xff]  }
 0x16a   : > { %3773 = vmatprep.subr.bf16.mxu1 %v5656_v43  ;;  %3760 = vmatprep.mubr.bf16.mxu0 %v6436_v53  ;;  %v5740_v43 = vld [vmem:[#allocation7 + $0x304] ss:$16 sps:$4 sm:$0xff]  }
 0x16b   : > { %3803 = vmatprep.mubr.bf16.mxu1 %v6438_v54 }
 0x16c   : > { %3731 = vmatpush1.bf16.msra.mxu0 %v5651_v44  ;;  %v5735_v44 = vld [vmem:[#allocation7 + $0x100] ss:$16 sps:$4 sm:$0xff]  }
 0x16d   : > { %3774 = vmatpush1.bf16.msra.mxu1 %v5654_v45  ;;  %3732 = vmatprep.subr.bf16.mxu0 %v5659_v46  ;;  %v5738_v45 = vld [vmem:[#allocation7 + $0x300] ss:$16 sps:$4 sm:$0xff]   ;;  %v5743_v46 = vld [vmem:[#allocation7 + $0x4e4] ss:$16 sps:$4 sm:$0xff]  }
 0x16e   : > { %3775 = vmatprep.subr.bf16.mxu1 %v5662_v47  ;;  %v5746_v47 = vld [vmem:[#allocation7 + $0x6e4] ss:$16 sps:$4 sm:$0xff]  }
 0x170   : > { %3733 = vmatpush1.bf16.msra.mxu0 %v5657_v48  ;;  %v5741_v48 = vld [vmem:[#allocation7 + $0x4e0] ss:$16 sps:$4 sm:$0xff]  }
 0x171   : > { %3776 = vmatpush1.bf16.msra.mxu1 %v5660_v49  ;;  %3734 = vmatprep.subr.bf16.mxu0 %v5665_v50  ;;  %v5744_v49 = vld [vmem:[#allocation7 + $0x6e0] ss:$16 sps:$4 sm:$0xff]   ;;  %v5749_v50 = vld [vmem:[#allocation7 + $0x4c4] ss:$16 sps:$4 sm:$0xff]  }
 0x172   : > { %3777 = vmatprep.subr.bf16.mxu1 %v5668_v51  ;;  %v5752_v51 = vld [vmem:[#allocation7 + $0x6c4] ss:$16 sps:$4 sm:$0xff]  }
 0x174   : > { %3735 = vmatpush1.bf16.msra.mxu0 %v5663_v52  ;;  %v5747_v52 = vld [vmem:[#allocation7 + $0x4c0] ss:$16 sps:$4 sm:$0xff]  }
 0x175   : > { %3778 = vmatpush1.bf16.msra.mxu1 %v5666_v55  ;;  %3736 = vmatprep.subr.bf16.mxu0 %v5671_v56  ;;  %v5750_v55 = vld [vmem:[#allocation7 + $0x6c0] ss:$16 sps:$4 sm:$0xff]   ;;  %v5755_v56 = vld [vmem:[#allocation7 + $0x4a4] ss:$16 sps:$4 sm:$0xff]  }
 0x176   : > { %3779 = vmatprep.subr.bf16.mxu1 %v5674_v57  ;;  %v5758_v57 = vld [vmem:[#allocation7 + $0x6a4] ss:$16 sps:$4 sm:$0xff]  }
 0x178   : > { %3737 = vmatpush1.bf16.msra.mxu0 %v5669_v58  ;;  %v5753_v58 = vld [vmem:[#allocation7 + $0x4a0] ss:$16 sps:$4 sm:$0xff]  }
 0x179   : > { %3780 = vmatpush1.bf16.msra.mxu1 %v5672_v59  ;;  %3738 = vmatprep.subr.bf16.mxu0 %v5677_v60  ;;  %v5756_v59 = vld [vmem:[#allocation7 + $0x6a0] ss:$16 sps:$4 sm:$0xff]   ;;  %v5761_v60 = vld [vmem:[#allocation7 + $0x484] ss:$16 sps:$4 sm:$0xff]  }
 0x17a   : > { %3781 = vmatprep.subr.bf16.mxu1 %v5680_v61  ;;  %v5764_v61 = vld [vmem:[#allocation7 + $0x684] ss:$16 sps:$4 sm:$0xff]  }
 0x17c   : > { %3739 = vmatpush1.bf16.msra.mxu0 %v5675_v62  ;;  %v5759_v62 = vld [vmem:[#allocation7 + $0x480] ss:$16 sps:$4 sm:$0xff]  }
 0x17d   : > { %3782 = vmatpush1.bf16.msra.mxu1 %v5678_v63  ;;  %3740 = vmatprep.subr.bf16.mxu0 %v5683_v0  ;;  %v5762_v63 = vld [vmem:[#allocation7 + $0x680] ss:$16 sps:$4 sm:$0xff]   ;;  %v5767_v0 = vld [vmem:[#allocation7 + $0x464] ss:$16 sps:$4 sm:$0xff]  }
 0x17e   : > { %3783 = vmatprep.subr.bf16.mxu1 %v5686_v1  ;;  %v5770_v1 = vld [vmem:[#allocation7 + $0x664] ss:$16 sps:$4 sm:$0xff]  }
 0x180   : > { %3741 = vmatpush1.bf16.msra.mxu0 %v5681_v2  ;;  %v5765_v2 = vld [vmem:[#allocation7 + $0x460] ss:$16 sps:$4 sm:$0xff]  }
 0x181   : > { %3784 = vmatpush1.bf16.msra.mxu1 %v5684_v3  ;;  %3742 = vmatprep.subr.bf16.mxu0 %v5689_v4  ;;  %v5768_v3 = vld [vmem:[#allocation7 + $0x660] ss:$16 sps:$4 sm:$0xff]   ;;  %v5773_v4 = vld [vmem:[#allocation7 + $0x444] ss:$16 sps:$4 sm:$0xff]  }
 0x182   : > { %3785 = vmatprep.subr.bf16.mxu1 %v5692_v5  ;;  %v5776_v5 = vld [vmem:[#allocation7 + $0x644] ss:$16 sps:$4 sm:$0xff]  }
 0x184   : > { %3743 = vmatpush1.bf16.msra.mxu0 %v5687_v6  ;;  %v5771_v6 = vld [vmem:[#allocation7 + $0x440] ss:$16 sps:$4 sm:$0xff]  }
 0x185   : > { %3786 = vmatpush1.bf16.msra.mxu1 %v5690_v7  ;;  %3744 = vmatprep.subr.bf16.mxu0 %v5695_v10  ;;  %v5774_v7 = vld [vmem:[#allocation7 + $0x640] ss:$16 sps:$4 sm:$0xff]   ;;  %v5779_v10 = vld [vmem:[#allocation7 + $0x424] ss:$16 sps:$4 sm:$0xff]  }
 0x186   : > { %3787 = vmatprep.subr.bf16.mxu1 %v5698_v11  ;;  %v5782_v11 = vld [vmem:[#allocation7 + $0x624] ss:$16 sps:$4 sm:$0xff]  }
 0x188   : > { %3745 = vmatpush2.bf16.msra.mxu0 %v5693_v12  ;;  %v5777_v12 = vld [vmem:[#allocation7 + $0x420] ss:$16 sps:$4 sm:$0xff]  }
 0x189   : > { %3788 = vmatpush2.bf16.msra.mxu1 %v5696_v13  ;;  %3746 = vmatprep.subr.bf16.mxu0 %v5701_v14  ;;  %v5780_v13 = vld [vmem:[#allocation7 + $0x620] ss:$16 sps:$4 sm:$0xff]   ;;  %v5785_v14 = vld [vmem:[#allocation7 + $0x404] ss:$16 sps:$4 sm:$0xff]  }
 0x18a   : > { %3789 = vmatprep.subr.bf16.mxu1 %v5704_v15  ;;  %v5788_v15 = vld [vmem:[#allocation7 + $0x604] ss:$16 sps:$4 sm:$0xff]  }
 0x18c   : > { %3747 = vmatpush2.bf16.msra.mxu0 %v5699_v16  ;;  %v5783_v16 = vld [vmem:[#allocation7 + $0x400] ss:$16 sps:$4 sm:$0xff]  }
 0x18d   : > { %3790 = vmatpush2.bf16.msra.mxu1 %v5702_v17  ;;  %3748 = vmatprep.subr.bf16.mxu0 %v5707_v18  ;;  %v5786_v17 = vld [vmem:[#allocation7 + $0x600] ss:$16 sps:$4 sm:$0xff]   ;;  %v5791_v18 = vld [vmem:[#allocation7 + $0x5e4] ss:$16 sps:$4 sm:$0xff]  }
 0x18e   : > { %3791 = vmatprep.subr.bf16.mxu1 %v5710_v19  ;;  %v5794_v19 = vld [vmem:[#allocation7 + $0x7e4] ss:$16 sps:$4 sm:$0xff]  }
 0x190   : > { %3749 = vmatpush2.bf16.msra.mxu0 %v5705_v22  ;;  %v5789_v22 = vld [vmem:[#allocation7 + $0x5e0] ss:$16 sps:$4 sm:$0xff]  }
 0x191   : > { %3792 = vmatpush2.bf16.msra.mxu1 %v5708_v23  ;;  %3750 = vmatprep.subr.bf16.mxu0 %v5713_v24  ;;  %v5792_v23 = vld [vmem:[#allocation7 + $0x7e0] ss:$16 sps:$4 sm:$0xff]   ;;  %v5797_v24 = vld [vmem:[#allocation7 + $0x5c4] ss:$16 sps:$4 sm:$0xff]  }
 0x192   : > { %3793 = vmatprep.subr.bf16.mxu1 %v5716_v25  ;;  %v5800_v25 = vld [vmem:[#allocation7 + $0x7c4] ss:$16 sps:$4 sm:$0xff]  }
 0x194   : > { %3751 = vmatpush2.bf16.msra.mxu0 %v5711_v26  ;;  %v5795_v26 = vld [vmem:[#allocation7 + $0x5c0] ss:$16 sps:$4 sm:$0xff]  }
 0x195   : > { %3794 = vmatpush2.bf16.msra.mxu1 %v5714_v27  ;;  %3752 = vmatprep.subr.bf16.mxu0 %v5719_v28  ;;  %v5798_v27 = vld [vmem:[#allocation7 + $0x7c0] ss:$16 sps:$4 sm:$0xff]   ;;  %v5803_v28 = vld [vmem:[#allocation7 + $0x5a4] ss:$16 sps:$4 sm:$0xff]  }
 0x196   : > { %3795 = vmatprep.subr.bf16.mxu1 %v5722_v29  ;;  %v5806_v29 = vld [vmem:[#allocation7 + $0x7a4] ss:$16 sps:$4 sm:$0xff]  }
 0x198   : > { %3753 = vmatpush2.bf16.msra.mxu0 %v5717_v30  ;;  %v6494_v30 = vpop.f32.mrf.mxu0 }
 0x199   : > { %3796 = vmatpush2.bf16.msra.mxu1 %v5720_v31  ;;  %3754 = vmatprep.subr.bf16.mxu0 %v5725_v32  ;;  %v6496_v31 = vpop.f32.mrf.mxu1  ;;  %v5801_v32 = vld [vmem:[#allocation7 + $0x5a0] ss:$16 sps:$4 sm:$0xff]  }
 0x19a   : > { %3797 = vmatprep.subr.bf16.mxu1 %v5728_v33  ;;  %v5804_v33 = vld [vmem:[#allocation7 + $0x7a0] ss:$16 sps:$4 sm:$0xff]  }
 0x19c   : > { %3755 = vmatpush2.bf16.msra.mxu0 %v5723_v34  ;;  %v5809_v34 = vld [vmem:[#allocation7 + $0x584] ss:$16 sps:$4 sm:$0xff]  }
 0x19d   : > { %3798 = vmatpush2.bf16.msra.mxu1 %v5726_v35  ;;  %3756 = vmatprep.subr.bf16.mxu0 %v5731_v36  ;;  %v5812_v35 = vld [vmem:[#allocation7 + $0x784] ss:$16 sps:$4 sm:$0xff]   ;;  %v6498_v36 = vpop.f32.mrf.mxu0 }
 0x19e   : > { %3799 = vmatprep.subr.bf16.mxu1 %v5734_v37  ;;  %v6500_v37 = vpop.f32.mrf.mxu1 }
 0x1a0   : > { %3757 = vmatpush2.bf16.msra.mxu0 %v5729_v38  ;;  %v5807_v38 = vld [vmem:[#allocation7 + $0x580] ss:$16 sps:$4 sm:$0xff]  }
 0x1a1   : > { %3800 = vmatpush2.bf16.msra.mxu1 %v5732_v39  ;;  %3758 = vmatprep.subr.bf16.mxu0 %v5737_v40  ;;  %v5810_v39 = vld [vmem:[#allocation7 + $0x780] ss:$16 sps:$4 sm:$0xff]   ;;  %v5815_v40 = vld [vmem:[#allocation7 + $0x564] ss:$16 sps:$4 sm:$0xff]  }
 0x1a2   : > { %3801 = vmatprep.subr.bf16.mxu1 %v5740_v43  ;;  %v5818_v43 = vld [vmem:[#allocation7 + $0x764] ss:$16 sps:$4 sm:$0xff]  }
 0x1a4   : > { %3759 = vmatpush2.bf16.msra.mxu0 %v5735_v44  ;;  %v6502_v44 = vpop.f32.mrf.mxu0 }
 0x1a5   : > { %3802 = vmatpush2.bf16.msra.mxu1 %v5738_v45  ;;  %3814 = vmatprep.subr.bf16.mxu0 %v5743_v46  ;;  %v6504_v45 = vpop.f32.mrf.mxu1  ;;  %v5813_v46 = vld [vmem:[#allocation7 + $0x560] ss:$16 sps:$4 sm:$0xff]  }
 0x1a6   : > { %3857 = vmatprep.subr.bf16.mxu1 %v5746_v47  ;;  %v5816_v47 = vld [vmem:[#allocation7 + $0x760] ss:$16 sps:$4 sm:$0xff]  }
 0x1a7   : > { %3761 = vmatmul.mubr.bf16.vlgmr.msra.gmra.mxu0 %v6442_v8 }
 0x1a8   : > { %3804 = vmatmul.mubr.bf16.vlgmr.msra.gmra.mxu1 %v6444_v9  ;;  %3815 = vmatpush1.bf16.msra.mxu0 %v5741_v48  ;;  %v5821_v48 = vld [vmem:[#allocation7 + $0x544] ss:$16 sps:$4 sm:$0xff]  }
 0x1a9   : > { %3858 = vmatpush1.bf16.msra.mxu1 %v5744_v49  ;;  %3816 = vmatprep.subr.bf16.mxu0 %v5749_v50  ;;  %v5824_v49 = vld [vmem:[#allocation7 + $0x744] ss:$16 sps:$4 sm:$0xff]   ;;  %v6506_v50 = vpop.f32.mrf.mxu0 }
 0x1aa   : > { %3859 = vmatprep.subr.bf16.mxu1 %v5752_v51  ;;  %3846 = vmatprep.mubr.bf16.mxu0 %v6462_v41  ;;  %v6508_v51 = vpop.f32.mrf.mxu1 }
 0x1ab   : > { %3889 = vmatprep.mubr.bf16.mxu1 %v6466_v42 }
 0x1ac   : > { %3817 = vmatpush1.bf16.msra.mxu0 %v5747_v52  ;;  %v5819_v52 = vld [vmem:[#allocation7 + $0x540] ss:$16 sps:$4 sm:$0xff]  }
 0x1ad   : > { %3860 = vmatpush1.bf16.msra.mxu1 %v5750_v55  ;;  %3818 = vmatprep.subr.bf16.mxu0 %v5755_v56  ;;  %v5822_v55 = vld [vmem:[#allocation7 + $0x740] ss:$16 sps:$4 sm:$0xff]   ;;  %v6510_v56 = vpop.f32.mrf.mxu0 }
 0x1ae   : > { %3861 = vmatprep.subr.bf16.mxu1 %v5758_v57  ;;  %v6512_v57 = vpop.f32.mrf.mxu1 }
 0x1b0   : > { %3819 = vmatpush1.bf16.msra.mxu0 %v5753_v58  ;;  %v5827_v58 = vld [vmem:[#allocation7 + $0x524] ss:$16 sps:$4 sm:$0xff]  }
 0x1b1   : > { %3862 = vmatpush1.bf16.msra.mxu1 %v5756_v59  ;;  %3820 = vmatprep.subr.bf16.mxu0 %v5761_v60  ;;  %v5830_v59 = vld [vmem:[#allocation7 + $0x724] ss:$16 sps:$4 sm:$0xff]   ;;  %v5825_v60 = vld [vmem:[#allocation7 + $0x520] ss:$16 sps:$4 sm:$0xff]  }
 0x1b2   : > { %3863 = vmatprep.subr.bf16.mxu1 %v5764_v61  ;;  %v5828_v61 = vld [vmem:[#allocation7 + $0x720] ss:$16 sps:$4 sm:$0xff]  }
 0x1b4   : > { %3821 = vmatpush1.bf16.msra.mxu0 %v5759_v62  ;;  %v6514_v62 = vpop.f32.mrf.mxu0 }
 0x1b5   : > { %3864 = vmatpush1.bf16.msra.mxu1 %v5762_v63  ;;  %3822 = vmatprep.subr.bf16.mxu0 %v5767_v0  ;;  %v6516_v63 = vpop.f32.mrf.mxu1  ;;  %v5833_v0 = vld [vmem:[#allocation7 + $0x504] ss:$16 sps:$4 sm:$0xff]  }
 0x1b6   : > { %3865 = vmatprep.subr.bf16.mxu1 %v5770_v1  ;;  %v5836_v1 = vld [vmem:[#allocation7 + $0x704] ss:$16 sps:$4 sm:$0xff]  }
 0x1b8   : > { %3823 = vmatpush1.bf16.msra.mxu0 %v5765_v2  ;;  %v5831_v2 = vld [vmem:[#allocation7 + $0x500] ss:$16 sps:$4 sm:$0xff]  }
 0x1b9   : > { %3866 = vmatpush1.bf16.msra.mxu1 %v5768_v3  ;;  %3824 = vmatprep.subr.bf16.mxu0 %v5773_v4  ;;  %v5834_v3 = vld [vmem:[#allocation7 + $0x700] ss:$16 sps:$4 sm:$0xff]   ;;  %v6518_v4 = vpop.f32.mrf.mxu0 }
 0x1ba   : > { %3867 = vmatprep.subr.bf16.mxu1 %v5776_v5  ;;  %v6520_v5 = vpop.f32.mrf.mxu1 }
 0x1bc   : > { %3825 = vmatpush1.bf16.msra.mxu0 %v5771_v6  ;;  %v5839_v6 = vld [vmem:[#allocation7 + $0xec] ss:$16 sps:$4 sm:$0xff]  }
 0x1bd   : > { %3868 = vmatpush1.bf16.msra.mxu1 %v5774_v7  ;;  %3826 = vmatprep.subr.bf16.mxu0 %v5779_v10  ;;  %v5842_v7 = vld [vmem:[#allocation7 + $0x2ec] ss:$16 sps:$4 sm:$0xff]   ;;  %v5837_v10 = vld [vmem:[#allocation7 + $0xe8] ss:$16 sps:$4 sm:$0xff]  }
 0x1be   : > { %3869 = vmatprep.subr.bf16.mxu1 %v5782_v11  ;;  %v5840_v11 = vld [vmem:[#allocation7 + $0x2e8] ss:$16 sps:$4 sm:$0xff]  }
 0x1c0   : > { %3827 = vmatpush1.bf16.msra.mxu0 %v5777_v12  ;;  %v6522_v12 = vpop.f32.mrf.mxu0 }
 0x1c1   : > { %3870 = vmatpush1.bf16.msra.mxu1 %v5780_v13  ;;  %3828 = vmatprep.subr.bf16.mxu0 %v5785_v14  ;;  %v6524_v13 = vpop.f32.mrf.mxu1  ;;  %v5845_v14 = vld [vmem:[#allocation7 + $0xcc] ss:$16 sps:$4 sm:$0xff]  }
 0x1c2   : > { %3871 = vmatprep.subr.bf16.mxu1 %v5788_v15  ;;  %v5848_v15 = vld [vmem:[#allocation7 + $0x2cc] ss:$16 sps:$4 sm:$0xff]  }
 0x1c4   : > { %3829 = vmatpush1.bf16.msra.mxu0 %v5783_v16 }
 0x1c5   : > { %3872 = vmatpush1.bf16.msra.mxu1 %v5786_v17  ;;  %3830 = vmatprep.subr.bf16.mxu0 %v5791_v18 }
 0x1c6   : > { %3873 = vmatprep.subr.bf16.mxu1 %v5794_v19  ;;  %v5843_v19 = vld [vmem:[#allocation7 + $0xc8] ss:$16 sps:$4 sm:$0xff]  }
 0x1c8   : > { %3831 = vmatpush2.bf16.msra.mxu0 %v5789_v22  ;;  %v5846_v22 = vld [vmem:[#allocation7 + $0x2c8] ss:$16 sps:$4 sm:$0xff]  }
 0x1c9   : > { %3874 = vmatpush2.bf16.msra.mxu1 %v5792_v23  ;;  %3832 = vmatprep.subr.bf16.mxu0 %v5797_v24 }
 0x1ca   : > { %3875 = vmatprep.subr.bf16.mxu1 %v5800_v25  ;;  %v5851_v25 = vld [vmem:[#allocation7 + $0xac] ss:$16 sps:$4 sm:$0xff]  }
 0x1cc   : > { %3833 = vmatpush2.bf16.msra.mxu0 %v5795_v26  ;;  %v5854_v26 = vld [vmem:[#allocation7 + $0x2ac] ss:$16 sps:$4 sm:$0xff]  }
 0x1cd   : > { %3876 = vmatpush2.bf16.msra.mxu1 %v5798_v27  ;;  %3834 = vmatprep.subr.bf16.mxu0 %v5803_v28 }
 0x1ce   : > { %3877 = vmatprep.subr.bf16.mxu1 %v5806_v29 }
 0x1d0   : > { %3835 = vmatpush2.bf16.msra.mxu0 %v5801_v32 }
 0x1d1   : > { %3878 = vmatpush2.bf16.msra.mxu1 %v5804_v33  ;;  %3836 = vmatprep.subr.bf16.mxu0 %v5809_v34  ;;  %v5849_v33 = vld [vmem:[#allocation7 + $0xa8] ss:$16 sps:$4 sm:$0xff]  }
 0x1d2   : > { %3879 = vmatprep.subr.bf16.mxu1 %v5812_v35  ;;  %v5852_v34 = vld [vmem:[#allocation7 + $0x2a8] ss:$16 sps:$4 sm:$0xff]  }
 0x1d4   : > { %3837 = vmatpush2.bf16.msra.mxu0 %v5807_v38 }
 0x1d5   : > { %3880 = vmatpush2.bf16.msra.mxu1 %v5810_v39  ;;  %3838 = vmatprep.subr.bf16.mxu0 %v5815_v40  ;;  %v5857_v39 = vld [vmem:[#allocation7 + $0x8c] ss:$16 sps:$4 sm:$0xff]  }
 0x1d6   : > { %3881 = vmatprep.subr.bf16.mxu1 %v5818_v43  ;;  %v5860_v40 = vld [vmem:[#allocation7 + $0x28c] ss:$16 sps:$4 sm:$0xff]  }
 0x1d8   : > { %3839 = vmatpush2.bf16.msra.mxu0 %v5813_v46  ;;  %v5863_v46 = vld [vmem:[#allocation7 + $0x6c] ss:$16 sps:$4 sm:$0xff]  }
 0x1d9   : > { %3882 = vmatpush2.bf16.msra.mxu1 %v5816_v47  ;;  %3840 = vmatprep.subr.bf16.mxu0 %v5821_v48  ;;  %v5866_v47 = vld [vmem:[#allocation7 + $0x26c] ss:$16 sps:$4 sm:$0xff]   ;;  %v5861_v48 = vld [vmem:[#allocation7 + $0x68] ss:$16 sps:$4 sm:$0xff]  }
 0x1da   : > { %3883 = vmatprep.subr.bf16.mxu1 %v5824_v49  ;;  %v5864_v49 = vld [vmem:[#allocation7 + $0x268] ss:$16 sps:$4 sm:$0xff]  }
 0x1dc   : > { %3841 = vmatpush2.bf16.msra.mxu0 %v5819_v52  ;;  %v5869_v52 = vld [vmem:[#allocation7 + $0x4c] ss:$16 sps:$4 sm:$0xff]  }
 0x1dd   : > { %3884 = vmatpush2.bf16.msra.mxu1 %v5822_v55  ;;  %3842 = vmatprep.subr.bf16.mxu0 %v5827_v58  ;;  %v5872_v55 = vld [vmem:[#allocation7 + $0x24c] ss:$16 sps:$4 sm:$0xff]   ;;  %v5867_v58 = vld [vmem:[#allocation7 + $0x48] ss:$16 sps:$4 sm:$0xff]  }
 0x1de   : > { %3885 = vmatprep.subr.bf16.mxu1 %v5830_v59  ;;  %v5870_v59 = vld [vmem:[#allocation7 + $0x248] ss:$16 sps:$4 sm:$0xff]  }
 0x1e0   : > { %3843 = vmatpush2.bf16.msra.mxu0 %v5825_v60  ;;  %v5875_v60 = vld [vmem:[#allocation7 + $0x2c] ss:$16 sps:$4 sm:$0xff]  }
 0x1e1   : > { %3886 = vmatpush2.bf16.msra.mxu1 %v5828_v61  ;;  %3844 = vmatprep.subr.bf16.mxu0 %v5833_v0  ;;  %v5878_v61 = vld [vmem:[#allocation7 + $0x22c] ss:$16 sps:$4 sm:$0xff]   ;;  %v5873_v0 = vld [vmem:[#allocation7 + $0x28] ss:$16 sps:$4 sm:$0xff]  }
 0x1e2   : > { %3887 = vmatprep.subr.bf16.mxu1 %v5836_v1  ;;  %v5876_v1 = vld [vmem:[#allocation7 + $0x228] ss:$16 sps:$4 sm:$0xff]  }
 0x1e4   : > { %3845 = vmatpush2.bf16.msra.mxu0 %v5831_v2  ;;  %v5881_v2 = vld [vmem:[#allocation7 + $0xc] ss:$16 sps:$4 sm:$0xff]  }
 0x1e5   : > { %3888 = vmatpush2.bf16.msra.mxu1 %v5834_v3  ;;  %3900 = vmatprep.subr.bf16.mxu0 %v5839_v6  ;;  %v5884_v3 = vld [vmem:[#allocation7 + $0x20c] ss:$16 sps:$4 sm:$0xff]   ;;  %v5879_v6 = vld [vmem:[#allocation7 + $0x8] ss:$16 sps:$4 sm:$0xff]  }
 0x1e6   : > { %3943 = vmatprep.subr.bf16.mxu1 %v5842_v7  ;;  %v5882_v7 = vld [vmem:[#allocation7 + $0x208] ss:$16 sps:$4 sm:$0xff]  }
 0x1e7   : > { %v2054_v16 = vpop.f32.mrf.mxu0  ;;  %3847 = vmatmul.mubr.bf16.vlgmr.msra.gmra.mxu0 %v6472_v20 }
 0x1e8   : > { %v2097_v17 = vpop.f32.mrf.mxu1  ;;  %3890 = vmatmul.mubr.bf16.vlgmr.msra.gmra.mxu1 %v6476_v21  ;;  %3901 = vmatpush1.bf16.msra.mxu0 %v5837_v10  ;;  %v5887_v10 = vld [vmem:[#allocation7 + $0x1ec] ss:$16 sps:$4 sm:$0xff]  }
 0x1e9   : > { %v6528_v18 = vadd.f32 %v2097_v17, %v2054_v16  ;;  %3944 = vmatpush1.bf16.msra.mxu1 %v5840_v11  ;;  %v2056_v23 = vpop.f32.mrf.mxu0  ;;  %3902 = vmatprep.subr.bf16.mxu0 %v5845_v14  ;;  %v5890_v11 = vld [vmem:[#allocation7 + $0x3ec] ss:$16 sps:$4 sm:$0xff]   ;;  %v5885_v14 = vld [vmem:[#allocation7 + $0x1e8] ss:$16 sps:$4 sm:$0xff]  }
 0x1ea   : > { %v2099_v24 = vpop.f32.mrf.mxu1  ;;  %3945 = vmatprep.subr.bf16.mxu1 %v5848_v15  ;;  %3932 = vmatprep.mubr.bf16.mxu0 %v6436_v53  ;;  %v5855_v53 = vld [vmem:[#allocation7 + $0x88] ss:$16 sps:$4 sm:$0xff]   ;;  %v5893_v16 = vld [vmem:[#allocation7 + $0x1cc] ss:$16 sps:$4 sm:$0xff]  }
 0x1eb   : > { %v6530_v27 = vadd.f32 %v2099_v24, %v2056_v23  ;;  %3975 = vmatprep.mubr.bf16.mxu1 %v6438_v54  ;;  %v2058_v28 = vpop.f32.mrf.mxu0  ;;  %v5858_v54 = vld [vmem:[#allocation7 + $0x288] ss:$16 sps:$4 sm:$0xff]   ;;  %v5896_v17 = vld [vmem:[#allocation7 + $0x3cc] ss:$16 sps:$4 sm:$0xff]  }
 0x1ec   : > { %v2101_v29 = vpop.f32.mrf.mxu1  ;;  %3903 = vmatpush1.bf16.msra.mxu0 %v5843_v19  ;;  %v5888_v15 = vld [vmem:[#allocation7 + $0x3e8] ss:$16 sps:$4 sm:$0xff]   ;;  %v5899_v23 = vld [vmem:[#allocation7 + $0x1ac] ss:$16 sps:$4 sm:$0xff]  }
 0x1ed   : > { %v6534_v32 = vadd.f32 %v2101_v29, %v2058_v28  ;;  %3946 = vmatpush1.bf16.msra.mxu1 %v5846_v22  ;;  %v2060_v35 = vpop.f32.mrf.mxu0  ;;  %3904 = vmatprep.subr.bf16.mxu0 %v5851_v25  ;;  %v5891_v19 = vld [vmem:[#allocation7 + $0x1c8] ss:$16 sps:$4 sm:$0xff]   ;;  %v5902_v24 = vld [vmem:[#allocation7 + $0x3ac] ss:$16 sps:$4 sm:$0xff]  }
 0x1ee   : > { %v2103_v38 = vpop.f32.mrf.mxu1  ;;  %3947 = vmatprep.subr.bf16.mxu1 %v5854_v26  ;;  %v5894_v22 = vld [vmem:[#allocation7 + $0x3c8] ss:$16 sps:$4 sm:$0xff]   ;;  %v5905_v28 = vld [vmem:[#allocation7 + $0x18c] ss:$16 sps:$4 sm:$0xff]  }
 0x1ef   : > { %v6536_v43 = vadd.f32 %v2103_v38, %v2060_v35  ;;  %v5897_v25 = vld [vmem:[#allocation7 + $0x1a8] ss:$16 sps:$4 sm:$0xff]   ;;  %v5908_v29 = vld [vmem:[#allocation7 + $0x38c] ss:$16 sps:$4 sm:$0xff]  }
 0x1f0   : > { %3905 = vmatpush1.bf16.msra.mxu0 %v5849_v33  ;;  %v5900_v26 = vld [vmem:[#allocation7 + $0x3a8] ss:$16 sps:$4 sm:$0xff]   ;;  %v5911_v35 = vld [vmem:[#allocation7 + $0x16c] ss:$16 sps:$4 sm:$0xff]  }
 0x1f1   : > { %3948 = vmatpush1.bf16.msra.mxu1 %v5852_v34  ;;  %3906 = vmatprep.subr.bf16.mxu0 %v5857_v39  ;;  %v5903_v33 = vld [vmem:[#allocation7 + $0x188] ss:$16 sps:$4 sm:$0xff]   ;;  %v5914_v38 = vld [vmem:[#allocation7 + $0x36c] ss:$16 sps:$4 sm:$0xff]  }
 0x1f2   : > { %3949 = vmatprep.subr.bf16.mxu1 %v5860_v40  ;;  %v5906_v34 = vld [vmem:[#allocation7 + $0x388] ss:$16 sps:$4 sm:$0xff]  }
 0x1f3   : > { %v5909_v39 = vld [vmem:[#allocation7 + $0x168] ss:$16 sps:$4 sm:$0xff]  }
 0x1f4   : > { %3907 = vmatpush1.bf16.msra.mxu0 %v5855_v53  ;;  %v5912_v40 = vld [vmem:[#allocation7 + $0x368] ss:$16 sps:$4 sm:$0xff]   ;;  %v5917_v53 = vld [vmem:[#allocation7 + $0x14c] ss:$16 sps:$4 sm:$0xff]  }
 0x1f5   : > { %3950 = vmatpush1.bf16.msra.mxu1 %v5858_v54  ;;  %3908 = vmatprep.subr.bf16.mxu0 %v5863_v46  ;;  %v5920_v54 = vld [vmem:[#allocation7 + $0x34c] ss:$16 sps:$4 sm:$0xff]   ;;  %v5915_v46 = vld [vmem:[#allocation7 + $0x148] ss:$16 sps:$4 sm:$0xff]  }
 0x1f6   : > { %3951 = vmatprep.subr.bf16.mxu1 %v5866_v47  ;;  %v5918_v47 = vld [vmem:[#allocation7 + $0x348] ss:$16 sps:$4 sm:$0xff]  }
 0x1f8   : > { %3909 = vmatpush1.bf16.msra.mxu0 %v5861_v48  ;;  %v5923_v48 = vld [vmem:[#allocation7 + $0x12c] ss:$16 sps:$4 sm:$0xff]  }
 0x1f9   : > { %3952 = vmatpush1.bf16.msra.mxu1 %v5864_v49  ;;  %3910 = vmatprep.subr.bf16.mxu0 %v5869_v52  ;;  %v5926_v49 = vld [vmem:[#allocation7 + $0x32c] ss:$16 sps:$4 sm:$0xff]   ;;  %v5921_v52 = vld [vmem:[#allocation7 + $0x128] ss:$16 sps:$4 sm:$0xff]  }
 0x1fa   : > { %3953 = vmatprep.subr.bf16.mxu1 %v5872_v55  ;;  %v5924_v55 = vld [vmem:[#allocation7 + $0x328] ss:$16 sps:$4 sm:$0xff]  }
 0x1fc   : > { %3911 = vmatpush1.bf16.msra.mxu0 %v5867_v58  ;;  %v5929_v58 = vld [vmem:[#allocation7 + $0x10c] ss:$16 sps:$4 sm:$0xff]  }
 0x1fd   : > { %3954 = vmatpush1.bf16.msra.mxu1 %v5870_v59  ;;  %3912 = vmatprep.subr.bf16.mxu0 %v5875_v60  ;;  %v5932_v59 = vld [vmem:[#allocation7 + $0x30c] ss:$16 sps:$4 sm:$0xff]   ;;  %v5927_v60 = vld [vmem:[#allocation7 + $0x108] ss:$16 sps:$4 sm:$0xff]  }
 0x1fe   : > { %3955 = vmatprep.subr.bf16.mxu1 %v5878_v61  ;;  %v5930_v61 = vld [vmem:[#allocation7 + $0x308] ss:$16 sps:$4 sm:$0xff]  }
 0x200   : > { %3913 = vmatpush1.bf16.msra.mxu0 %v5873_v0  ;;  %v5935_v0 = vld [vmem:[#allocation7 + $0x4ec] ss:$16 sps:$4 sm:$0xff]  }
 0x201   : > { %3956 = vmatpush1.bf16.msra.mxu1 %v5876_v1  ;;  %3914 = vmatprep.subr.bf16.mxu0 %v5881_v2  ;;  %v5938_v1 = vld [vmem:[#allocation7 + $0x6ec] ss:$16 sps:$4 sm:$0xff]   ;;  %v5933_v2 = vld [vmem:[#allocation7 + $0x4e8] ss:$16 sps:$4 sm:$0xff]  }
 0x202   : > { %3957 = vmatprep.subr.bf16.mxu1 %v5884_v3  ;;  %v5936_v3 = vld [vmem:[#allocation7 + $0x6e8] ss:$16 sps:$4 sm:$0xff]  }
 0x204   : > { %3915 = vmatpush1.bf16.msra.mxu0 %v5879_v6  ;;  %v5941_v6 = vld [vmem:[#allocation7 + $0x4cc] ss:$16 sps:$4 sm:$0xff]  }
 0x205   : > { %3958 = vmatpush1.bf16.msra.mxu1 %v5882_v7  ;;  %3916 = vmatprep.subr.bf16.mxu0 %v5887_v10  ;;  %v5944_v7 = vld [vmem:[#allocation7 + $0x6cc] ss:$16 sps:$4 sm:$0xff]  }
 0x206   : > { %3959 = vmatprep.subr.bf16.mxu1 %v5890_v11 }
 0x208   : > { %3917 = vmatpush2.bf16.msra.mxu0 %v5885_v14 }
 0x209   : > { %3960 = vmatpush2.bf16.msra.mxu1 %v5888_v15  ;;  %3918 = vmatprep.subr.bf16.mxu0 %v5893_v16  ;;  %v5939_v15 = vld [vmem:[#allocation7 + $0x4c8] ss:$16 sps:$4 sm:$0xff]  }
 0x20a   : > { %3961 = vmatprep.subr.bf16.mxu1 %v5896_v17  ;;  %v5942_v16 = vld [vmem:[#allocation7 + $0x6c8] ss:$16 sps:$4 sm:$0xff]  }
 0x20c   : > { %3919 = vmatpush2.bf16.msra.mxu0 %v5891_v19 }
 0x20d   : > { %3962 = vmatpush2.bf16.msra.mxu1 %v5894_v22  ;;  %3920 = vmatprep.subr.bf16.mxu0 %v5899_v23  ;;  %v5947_v22 = vld [vmem:[#allocation7 + $0x4ac] ss:$16 sps:$4 sm:$0xff]  }
 0x20e   : > { %3963 = vmatprep.subr.bf16.mxu1 %v5902_v24  ;;  %v5950_v23 = vld [vmem:[#allocation7 + $0x6ac] ss:$16 sps:$4 sm:$0xff]  }
 0x210   : > { %3921 = vmatpush2.bf16.msra.mxu0 %v5897_v25 }
 0x211   : > { %3964 = vmatpush2.bf16.msra.mxu1 %v5900_v26  ;;  %3922 = vmatprep.subr.bf16.mxu0 %v5905_v28  ;;  %v5945_v28 = vld [vmem:[#allocation7 + $0x4a8] ss:$16 sps:$4 sm:$0xff]  }
 0x212   : > { %3965 = vmatprep.subr.bf16.mxu1 %v5908_v29  ;;  %v5948_v29 = vld [vmem:[#allocation7 + $0x6a8] ss:$16 sps:$4 sm:$0xff]  }
 0x214   : > { %3923 = vmatpush2.bf16.msra.mxu0 %v5903_v33 }
 0x215   : > { %3966 = vmatpush2.bf16.msra.mxu1 %v5906_v34  ;;  %3924 = vmatprep.subr.bf16.mxu0 %v5911_v35  ;;  %v5953_v34 = vld [vmem:[#allocation7 + $0x48c] ss:$16 sps:$4 sm:$0xff]  }
 0x216   : > { %3967 = vmatprep.subr.bf16.mxu1 %v5914_v38  ;;  %v5956_v35 = vld [vmem:[#allocation7 + $0x68c] ss:$16 sps:$4 sm:$0xff]  }
 0x218   : > { %3925 = vmatpush2.bf16.msra.mxu0 %v5909_v39  ;;  %v5951_v39 = vld [vmem:[#allocation7 + $0x488] ss:$16 sps:$4 sm:$0xff]  }
 0x219   : > { %3968 = vmatpush2.bf16.msra.mxu1 %v5912_v40  ;;  %3926 = vmatprep.subr.bf16.mxu0 %v5917_v53  ;;  %v5959_v40 = vld [vmem:[#allocation7 + $0x46c] ss:$16 sps:$4 sm:$0xff]  }
 0x21a   : > { %3969 = vmatprep.subr.bf16.mxu1 %v5920_v54  ;;  %v5962_v53 = vld [vmem:[#allocation7 + $0x66c] ss:$16 sps:$4 sm:$0xff]   ;;  %v5957_v54 = vld [vmem:[#allocation7 + $0x468] ss:$16 sps:$4 sm:$0xff]  }
 0x21c   : > { %3927 = vmatpush2.bf16.msra.mxu0 %v5915_v46  ;;  %v5960_v46 = vld [vmem:[#allocation7 + $0x668] ss:$16 sps:$4 sm:$0xff]  }
 0x21d   : > { %3970 = vmatpush2.bf16.msra.mxu1 %v5918_v47  ;;  %3928 = vmatprep.subr.bf16.mxu0 %v5923_v48  ;;  %v5965_v47 = vld [vmem:[#allocation7 + $0x44c] ss:$16 sps:$4 sm:$0xff]  }
 0x21e   : > { %3971 = vmatprep.subr.bf16.mxu1 %v5926_v49  ;;  %v5968_v48 = vld [vmem:[#allocation7 + $0x64c] ss:$16 sps:$4 sm:$0xff]   ;;  %v5966_v49 = vld [vmem:[#allocation7 + $0x648] ss:$16 sps:$4 sm:$0xff]  }
 0x220   : > { %3929 = vmatpush2.bf16.msra.mxu0 %v5921_v52  ;;  %v5971_v52 = vld [vmem:[#allocation7 + $0x42c] ss:$16 sps:$4 sm:$0xff]  }
 0x221   : > { %3972 = vmatpush2.bf16.msra.mxu1 %v5924_v55  ;;  %3930 = vmatprep.subr.bf16.mxu0 %v5929_v58  ;;  %v5974_v55 = vld [vmem:[#allocation7 + $0x62c] ss:$16 sps:$4 sm:$0xff]   ;;  %v5969_v58 = vld [vmem:[#allocation7 + $0x428] ss:$16 sps:$4 sm:$0xff]  }
 0x222   : > { %3973 = vmatprep.subr.bf16.mxu1 %v5932_v59  ;;  %v5972_v59 = vld [vmem:[#allocation7 + $0x628] ss:$16 sps:$4 sm:$0xff]  }
 0x224   : > { %3931 = vmatpush2.bf16.msra.mxu0 %v5927_v60  ;;  %v5977_v60 = vld [vmem:[#allocation7 + $0x40c] ss:$16 sps:$4 sm:$0xff]  }
 0x225   : > { %3974 = vmatpush2.bf16.msra.mxu1 %v5930_v61  ;;  %3986 = vmatprep.subr.bf16.mxu0 %v5935_v0  ;;  %v5980_v61 = vld [vmem:[#allocation7 + $0x60c] ss:$16 sps:$4 sm:$0xff]   ;;  %v5975_v0 = vld [vmem:[#allocation7 + $0x408] ss:$16 sps:$4 sm:$0xff]  }
 0x226   : > { %4029 = vmatprep.subr.bf16.mxu1 %v5938_v1  ;;  %v5978_v1 = vld [vmem:[#allocation7 + $0x608] ss:$16 sps:$4 sm:$0xff]  }
 0x227   : > { %v2140_v10 = vpop.f32.mrf.mxu0  ;;  %3933 = vmatmul.mubr.bf16.vlgmr.msra.gmra.mxu0 %v6442_v8 }
 0x228   : > { %v2183_v11 = vpop.f32.mrf.mxu1  ;;  %3976 = vmatmul.mubr.bf16.vlgmr.msra.gmra.mxu1 %v6444_v9  ;;  %v2141_v14 = vadd.f32 %v2140_v10, %v6528_v18  ;;  %3987 = vmatpush1.bf16.msra.mxu0 %v5933_v2  ;;  %v5983_v2 = vld [vmem:[#allocation7 + $0x5ec] ss:$16 sps:$4 sm:$0xff]  }
 0x229   : > { %4030 = vmatpush1.bf16.msra.mxu1 %v5936_v3  ;;  %v2142_v17 = vpop.f32.mrf.mxu0  ;;  %3988 = vmatprep.subr.bf16.mxu0 %v5941_v6  ;;  %v5986_v3 = vld [vmem:[#allocation7 + $0x7ec] ss:$16 sps:$4 sm:$0xff]   ;;  %v5981_v6 = vld [vmem:[#allocation7 + $0x5e8] ss:$16 sps:$4 sm:$0xff]  }
 0x22a   : > { %v2185_v19 = vpop.f32.mrf.mxu1  ;;  %4031 = vmatprep.subr.bf16.mxu1 %v5944_v7  ;;  %v6541_v24 = vadd.f32 %v2183_v11, %v2141_v14  ;;  %v2143_v25 = vadd.f32 %v2142_v17, %v6530_v27  ;;  %4018 = vmatprep.mubr.bf16.mxu0 %v6462_v41  ;;  %v5984_v7 = vld [vmem:[#allocation7 + $0x7e8] ss:$16 sps:$4 sm:$0xff]   ;;  %v5989_v10 = vld [vmem:[#allocation7 + $0x5cc] ss:$16 sps:$4 sm:$0xff]  }
 0x22b   : > { %4061 = vmatprep.mubr.bf16.mxu1 %v6466_v42  ;;  %v2144_v8 = vpop.f32.mrf.mxu0  ;;  %v5992_v11 = vld [vmem:[#allocation7 + $0x7cc] ss:$16 sps:$4 sm:$0xff]   ;;  %v5987_v14 = vld [vmem:[#allocation7 + $0x5c8] ss:$16 sps:$4 sm:$0xff]  }
 0x22c   : > { %v2187_v9 = vpop.f32.mrf.mxu1  ;;  %v6546_v18 = vadd.f32 %v2185_v19, %v2143_v25  ;;  %v2145_v26 = vadd.f32 %v2144_v8, %v6534_v32  ;;  %3989 = vmatpush1.bf16.msra.mxu0 %v5939_v15  ;;  %v5954_v32 = vld [vmem:[#allocation7 + $0x688] ss:$16 sps:$4 sm:$0xff]   ;;  %v5998_v17 = vld [vmem:[#allocation7 + $0x7ac] ss:$16 sps:$4 sm:$0xff]  }
 0x22d   : > { %4032 = vmatpush1.bf16.msra.mxu1 %v5942_v16  ;;  %v2146_v33 = vpop.f32.mrf.mxu0  ;;  %3990 = vmatprep.subr.bf16.mxu0 %v5947_v22  ;;  %v5990_v15 = vld [vmem:[#allocation7 + $0x7c8] ss:$16 sps:$4 sm:$0xff]   ;;  %v5995_v16 = vld [vmem:[#allocation7 + $0x5ac] ss:$16 sps:$4 sm:$0xff]  }
 0x22e   : > { %4033 = vmatprep.subr.bf16.mxu1 %v5950_v23  ;;  %v6549_v27 = vadd.f32 %v2187_v9, %v2145_v26  ;;  %v2147_v41 = vadd.f32 %v2146_v33, %v6536_v43  ;;  %v2189_v42 = vpop.f32.mrf.mxu1  ;;  %v5963_v43 = vld [vmem:[#allocation7 + $0x448] ss:$16 sps:$4 sm:$0xff]   ;;  %v6001_v23 = vld [vmem:[#allocation7 + $0x58c] ss:$16 sps:$4 sm:$0xff]  }
 0x22f   : > { %v5993_v19 = vld [vmem:[#allocation7 + $0x5a8] ss:$16 sps:$4 sm:$0xff]   ;;  %v6004_v25 = vld [vmem:[#allocation7 + $0x78c] ss:$16 sps:$4 sm:$0xff]  }
 0x230   : > { %v6552_v38 = vadd.f32 %v2189_v42, %v2147_v41  ;;  %3991 = vmatpush1.bf16.msra.mxu0 %v5945_v28  ;;  %v5996_v22 = vld [vmem:[#allocation7 + $0x7a8] ss:$16 sps:$4 sm:$0xff]   ;;  %v6007_v26 = vld [vmem:[#allocation7 + $0x56c] ss:$16 sps:$4 sm:$0xff]  }
 0x231   : > { %4034 = vmatpush1.bf16.msra.mxu1 %v5948_v29  ;;  %3992 = vmatprep.subr.bf16.mxu0 %v5953_v34  ;;  %v5999_v8 = vld [vmem:[#allocation7 + $0x588] ss:$16 sps:$4 sm:$0xff]   ;;  %v6010_v28 = vld [vmem:[#allocation7 + $0x76c] ss:$16 sps:$4 sm:$0xff]  }
 0x232   : > { %4035 = vmatprep.subr.bf16.mxu1 %v5956_v35  ;;  %v6002_v9 = vld [vmem:[#allocation7 + $0x788] ss:$16 sps:$4 sm:$0xff]   ;;  %v6013_v34 = vld [vmem:[#allocation7 + $0x54c] ss:$16 sps:$4 sm:$0xff]  }
 0x233   : > { %v6005_v29 = vld [vmem:[#allocation7 + $0x568] ss:$16 sps:$4 sm:$0xff]   ;;  %v6016_v35 = vld [vmem:[#allocation7 + $0x74c] ss:$16 sps:$4 sm:$0xff]  }
 0x234   : > { %3993 = vmatpush1.bf16.msra.mxu0 %v5951_v39  ;;  %v6008_v33 = vld [vmem:[#allocation7 + $0x768] ss:$16 sps:$4 sm:$0xff]   ;;  %v6019_v39 = vld [vmem:[#allocation7 + $0x52c] ss:$16 sps:$4 sm:$0xff]  }
 0x235   : > { %4036 = vmatpush1.bf16.msra.mxu1 %v5954_v32  ;;  %3994 = vmatprep.subr.bf16.mxu0 %v5959_v40  ;;  %v6011_v41 = vld [vmem:[#allocation7 + $0x548] ss:$16 sps:$4 sm:$0xff]   ;;  %v6022_v32 = vld [vmem:[#allocation7 + $0x72c] ss:$16 sps:$4 sm:$0xff]  }
 0x236   : > { %4037 = vmatprep.subr.bf16.mxu1 %v5962_v53  ;;  %v6014_v42 = vld [vmem:[#allocation7 + $0x748] ss:$16 sps:$4 sm:$0xff]  }
 0x237   : > { %v6017_v40 = vld [vmem:[#allocation7 + $0x528] ss:$16 sps:$4 sm:$0xff]  }
 0x238   : > { %3995 = vmatpush1.bf16.msra.mxu0 %v5957_v54  ;;  %v6020_v53 = vld [vmem:[#allocation7 + $0x728] ss:$16 sps:$4 sm:$0xff]   ;;  %v6025_v54 = vld [vmem:[#allocation7 + $0x50c] ss:$16 sps:$4 sm:$0xff]  }
 0x239   : > { %4038 = vmatpush1.bf16.msra.mxu1 %v5960_v46  ;;  %3996 = vmatprep.subr.bf16.mxu0 %v5965_v47  ;;  %v6028_v46 = vld [vmem:[#allocation7 + $0x70c] ss:$16 sps:$4 sm:$0xff]   ;;  %v6023_v47 = vld [vmem:[#allocation7 + $0x508] ss:$16 sps:$4 sm:$0xff]  }
 0x23a   : > { %4039 = vmatprep.subr.bf16.mxu1 %v5968_v48  ;;  %v6026_v48 = vld [vmem:[#allocation7 + $0x708] ss:$16 sps:$4 sm:$0xff]  }
 0x23c   : > { %3997 = vmatpush1.bf16.msra.mxu0 %v5963_v43  ;;  %v6029_v43 = vld [vmem:[#allocation8 + $0x78] sm:$0xff]  }
 0x23d   : > { %4040 = vmatpush1.bf16.msra.mxu1 %v5966_v49  ;;  %3998 = vmatprep.subr.bf16.mxu0 %v5971_v52  ;;  %v6030_v49 = vld [vmem:[#allocation8 + $0x38] sm:$0xff]   ;;  %v6031_v52 = vld [vmem:[#allocation8 + $0x70] sm:$0xff]  }
 0x23e   : > { %4041 = vmatprep.subr.bf16.mxu1 %v5974_v55  ;;  %v6032_v55 = vld [vmem:[#allocation8 + $0x30] sm:$0xff]  }
 0x240   : > { %3999 = vmatpush1.bf16.msra.mxu0 %v5969_v58  ;;  %v6033_v58 = vld [vmem:[#allocation8 + $0x68] sm:$0xff]  }
 0x241   : > { %4042 = vmatpush1.bf16.msra.mxu1 %v5972_v59  ;;  %4000 = vmatprep.subr.bf16.mxu0 %v5977_v60  ;;  %v6034_v59 = vld [vmem:[#allocation8 + $0x28] sm:$0xff]   ;;  %v6035_v60 = vld [vmem:[#allocation8 + $0x60] sm:$0xff]  }
 0x242   : > { %4043 = vmatprep.subr.bf16.mxu1 %v5980_v61  ;;  %v6045_v61 = vld [vmem:[#allocation8 + $0xf8] sm:$0xff]  }
 0x244   : > { %4001 = vmatpush1.bf16.msra.mxu0 %v5975_v0  ;;  %v6046_v0 = vld [vmem:[#allocation8 + $0xb8] sm:$0xff]  }
 0x245   : > { %4044 = vmatpush1.bf16.msra.mxu1 %v5978_v1  ;;  %4002 = vmatprep.subr.bf16.mxu0 %v5983_v2  ;;  %v6047_v1 = vld [vmem:[#allocation8 + $0xf0] sm:$0xff]   ;;  %v6036_v2 = vld [vmem:[#allocation8 + $0x20] sm:$0xff]  }
 0x246   : > { %4045 = vmatprep.subr.bf16.mxu1 %v5986_v3  ;;  %v6037_v3 = vld [vmem:[#allocation8 + $0x58] sm:$0xff]  }
 0x248   : > { %4003 = vmatpush2.bf16.msra.mxu0 %v5981_v6  ;;  %v6038_v6 = vld [vmem:[#allocation8 + $0x18] sm:$0xff]  }
 0x249   : > { %4046 = vmatpush2.bf16.msra.mxu1 %v5984_v7  ;;  %4004 = vmatprep.subr.bf16.mxu0 %v5989_v10  ;;  %v6039_v7 = vld [vmem:[#allocation8 + $0x50] sm:$0xff]   ;;  %v6050_v10 = vld [vmem:[#allocation8 + $0xa8] sm:$0xff]  }
 0x24a   : > { %4047 = vmatprep.subr.bf16.mxu1 %v5992_v11  ;;  %v6051_v11 = vld [vmem:[#allocation8 + $0xe0] sm:$0xff]  }
 0x24c   : > { %4005 = vmatpush2.bf16.msra.mxu0 %v5987_v14  ;;  %v6040_v14 = vld [vmem:[#allocation8 + $0x10] sm:$0xff]  }
 0x24d   : > { %4048 = vmatpush2.bf16.msra.mxu1 %v5990_v15  ;;  %4006 = vmatprep.subr.bf16.mxu0 %v5995_v16  ;;  %v6041_v15 = vld [vmem:[#allocation8 + $0x48] sm:$0xff]   ;;  %v6052_v16 = vld [vmem:[#allocation8 + $0xa0] sm:$0xff]  }
 0x24e   : > { %4049 = vmatprep.subr.bf16.mxu1 %v5998_v17  ;;  %v6042_v17 = vld [vmem:[#allocation8 + $0x8] sm:$0xff]  }
 0x250   : > { %4007 = vmatpush2.bf16.msra.mxu0 %v5993_v19  ;;  %v6043_v19 = vld [vmem:[#allocation8 + $0x40] sm:$0xff]  }
 0x251   : > { %4050 = vmatpush2.bf16.msra.mxu1 %v5996_v22  ;;  %4008 = vmatprep.subr.bf16.mxu0 %v6001_v23  ;;  %v6044_v22 = vld [vmem:[#allocation8] sm:$0xff]  }
 0x252   : > { %4051 = vmatprep.subr.bf16.mxu1 %v6004_v25 }
 0x254   : > { %4009 = vmatpush2.bf16.msra.mxu0 %v5999_v8 }
 0x255   : > { %4052 = vmatpush2.bf16.msra.mxu1 %v6002_v9  ;;  %4010 = vmatprep.subr.bf16.mxu0 %v6007_v26 }
 0x256   : > { %4053 = vmatprep.subr.bf16.mxu1 %v6010_v28 }
 0x258   : > { %4011 = vmatpush2.bf16.msra.mxu0 %v6005_v29 }
 0x259   : > { %4054 = vmatpush2.bf16.msra.mxu1 %v6008_v33  ;;  %4012 = vmatprep.subr.bf16.mxu0 %v6013_v34  ;;  %v1930_v34 = vadd.f32 %v6504_v45, %v6502_v44 }
 0x25a   : > { %4055 = vmatprep.subr.bf16.mxu1 %v6016_v35 }
 0x25c   : > { %4013 = vmatpush2.bf16.msra.mxu0 %v6011_v41 }
 0x25d   : > { %4056 = vmatpush2.bf16.msra.mxu1 %v6014_v42  ;;  %4014 = vmatprep.subr.bf16.mxu0 %v6019_v39  ;;  %v6053_v39 = vld [vmem:[#allocation8 + $0xd8] sm:$0xff]  }
 0x25e   : > { %4057 = vmatprep.subr.bf16.mxu1 %v6022_v32  ;;  %v1928_v32 = vadd.f32 %v6500_v37, %v6498_v36 }
 0x260   : > { %4015 = vmatpush2.bf16.msra.mxu0 %v6017_v40  ;;  %v1932_v40 = vadd.f32 %v6508_v51, %v6506_v50  ;;  %v1971_v45 = vadd.f32 %v6514_v62, %v1928_v32 }
 0x261   : > { %4058 = vmatpush2.bf16.msra.mxu1 %v6020_v53  ;;  %4016 = vmatprep.subr.bf16.mxu0 %v6025_v54  ;;  %v6054_v54 = vld [vmem:[#allocation8 + $0x98] sm:$0xff]  }
 0x262   : > { %4059 = vmatprep.subr.bf16.mxu1 %v6028_v46  ;;  %v1926_v46 = vadd.f32 %v6496_v31, %v6494_v30  ;;  %v2014_v62 = vadd.f32 %v6516_v63, %v1971_v45 }
 0x264   : > { %4017 = vmatpush2.bf16.msra.mxu0 %v6023_v47  ;;  %v1973_v47 = vadd.f32 %v6518_v4, %v1930_v34  ;;  %v1969_v37 = vadd.f32 %v6510_v56, %v1926_v46  ;;  %v6056_v4 = vld [vmem:[#allocation8 + $0x90] sm:$0xff]  }
 0x265   : > { %4060 = vmatpush2.bf16.msra.mxu1 %v6026_v48  ;;  %5132 = vmatprep.subr.bf16.mxu0 %v6029_v43 }
 0x266   : > { %5154 = vmatprep.subr.bf16.mxu1 %v6045_v61  ;;  %v2012_v56 = vadd.f32 %v6512_v57, %v1969_v37 }
 0x267   : > { %4019 = vmatmul.mubr.bf16.vlgmr.msra.gmra.mxu0 %v6472_v20  ;;  %v6048_v20 = vld [vmem:[#allocation8 + $0xb0] sm:$0xff]   ;;  %v3762_v23 = vpop.f32.mrf.mxu0 }
 0x268   : > { %4062 = vmatmul.mubr.bf16.vlgmr.msra.gmra.mxu1 %v6476_v21  ;;  %5133 = vmatpush3.bf16.msra.mxu0 %v6030_v49  ;;  %v6049_v21 = vld [vmem:[#allocation8 + $0xe8] sm:$0xff]   ;;  %v3805_v25 = vpop.f32.mrf.mxu1  ;;  %v1975_v49 = vadd.f32 %v6522_v12, %v1932_v40  ;;  %v4072_v63 = vmul.f32 %v2012_v56, %v2012_v56 }
 0x269   : > { %5134 = vmatprep.subr.bf16.mxu0 %v6031_v52  ;;  %5155 = vmatpush3.bf16.msra.mxu1 %v6046_v0  ;;  %v3764_v8 = vpop.f32.mrf.mxu0  ;;  %v3806_v35 = vadd.f32 %v3805_v25, %v3762_v23 }
 0x26a   : > { %5156 = vmatprep.subr.bf16.mxu1 %v6047_v1  ;;  %v3807_v9 = vpop.f32.mrf.mxu1  ;;  %v2018_v12 = vadd.f32 %v6524_v13, %v1975_v49 }
 0x26b   : > { %v3766_v26 = vpop.f32.mrf.mxu0  ;;  %v3808_v53 = vadd.f32 %v3807_v9, %v3764_v8 }
 0x26c   : > { %5135 = vmatpush3.bf16.msra.mxu0 %v6032_v55  ;;  %v3809_v28 = vpop.f32.mrf.mxu1  ;;  %v6055_v55 = vld [vmem:[#allocation8 + $0xd0] sm:$0xff]  }
 0x26d   : > { %5136 = vmatprep.subr.bf16.mxu0 %v6033_v58  ;;  %5157 = vmatpush3.bf16.msra.mxu1 %v6048_v20  ;;  %v3768_v29 = vpop.f32.mrf.mxu0  ;;  %v3810_v52 = vadd.f32 %v3809_v28, %v3766_v26 }
 0x26e   : > { %5158 = vmatprep.subr.bf16.mxu1 %v6049_v21  ;;  %v3811_v33 = vpop.f32.mrf.mxu1 }
 0x26f   : > { %v3812_v58 = vadd.f32 %v3811_v33, %v3768_v29 }
 0x270   : > { %5137 = vmatpush3.bf16.msra.mxu0 %v6034_v59  ;;  %v2016_v59 = vadd.f32 %v6520_v5, %v1973_v47 }
 0x271   : > { %5138 = vmatprep.subr.bf16.mxu0 %v6035_v60  ;;  %5159 = vmatpush3.bf16.msra.mxu1 %v6050_v10 }
 0x272   : > { %5160 = vmatprep.subr.bf16.mxu1 %v6051_v11  ;;  %v4076_v10 = vmul.f32 %v2016_v59, %v2016_v59  ;;  %v4073_v11 = vmul.f32 %v2014_v62, %v2014_v62 }
 0x274   : > { %5139 = vmatpush3.bf16.msra.mxu0 %v6036_v2 }
 0x275   : > { %5140 = vmatprep.subr.bf16.mxu0 %v6037_v3  ;;  %5161 = vmatpush3.bf16.msra.mxu1 %v6052_v16  ;;  %v6057_v3 = vld [vmem:[#allocation8 + $0xc8] sm:$0xff]   ;;  %v6059_v16 = vld [vmem:[#allocation8 + $0xc0] sm:$0xff]  }
 0x276   : > { %5162 = vmatprep.subr.bf16.mxu1 %v6053_v39 }
 0x278   : > { %5141 = vmatpush3.bf16.msra.mxu0 %v6038_v6 }
 0x279   : > { %5142 = vmatprep.subr.bf16.mxu0 %v6039_v7  ;;  %5163 = vmatpush3.bf16.msra.mxu1 %v6054_v54  ;;  %v6058_v7 = vld [vmem:[#allocation8 + $0x88] sm:$0xff]  }
 0x27a   : > { %5164 = vmatprep.subr.bf16.mxu1 %v6055_v55  ;;  %v4074_v55 = vmul.f32 %v6541_v24, %v6541_v24 }
 0x27c   : > { %5143 = vmatpush3.bf16.msra.mxu0 %v6040_v14  ;;  %v4077_v14 = vmul.f32 %v2018_v12, %v2018_v12 }
 0x27d   : > { %5144 = vmatprep.subr.bf16.mxu0 %v6041_v15  ;;  %5165 = vmatpush3.bf16.msra.mxu1 %v6056_v4 }
 0x27e   : > { %5166 = vmatprep.subr.bf16.mxu1 %v6057_v3 }
 0x280   : > { %5145 = vmatpush3.bf16.msra.mxu0 %v6042_v17 }
 0x281   : > { %5146 = vmatprep.subr.bf16.mxu0 %v6043_v19  ;;  %5167 = vmatpush3.bf16.msra.mxu1 %v6058_v7 }
 0x282   : > { %5168 = vmatprep.subr.bf16.mxu1 %v6059_v16 }
 0x284   : > { %5147 = vmatpush3.bf16.msra.mxu0 %v6044_v22  ;;  %v6060_v22 = vld [vmem:[#allocation8 + $0x80] sm:$0xff]  }
 0x285   : > { %5169 = vmatpush3.bf16.msra.mxu1 %v6060_v22 }
 0x2a7   : > { %v3848_v41 = vpop.f32.mrf.mxu0 }
 0x2a8   : > { %v3891_v42 = vpop.f32.mrf.mxu1  ;;  %v3849_v48 = vadd.f32 %v3848_v41, %v3806_v35 }
 0x2a9   : > { %v3850_v43 = vpop.f32.mrf.mxu0 }
 0x2aa   : > { %v3893_v44 = vpop.f32.mrf.mxu1  ;;  %v3851_v36 = vadd.f32 %v3850_v43, %v3808_v53  ;;  %v3892_v60 = vadd.f32 %v3891_v42, %v3849_v48 }
 0x2ab   : > { %v3852_v50 = vpop.f32.mrf.mxu0 }
 0x2ac   : > { %v3895_v51 = vpop.f32.mrf.mxu1  ;;  %v3894_v30 = vadd.f32 %v3893_v44, %v3851_v36  ;;  %v3853_v31 = vadd.f32 %v3852_v50, %v3810_v52  ;;  %v4080_v5 = vmul.f32 %v3892_v60, %v3892_v60  ;;  %v4075_v60 = vmul.f32 %v6546_v18, %v6546_v18 }
 0x2ad   : > { %v3854_v61 = vpop.f32.mrf.mxu0 }
 0x2ae   : > { %v3896_v0 = vadd.f32 %v3895_v51, %v3853_v31  ;;  %v3855_v1 = vadd.f32 %v3854_v61, %v3812_v58  ;;  %v3897_v2 = vpop.f32.mrf.mxu1  ;;  %v4081_v20 = vmul.f32 %v3894_v30, %v3894_v30  ;;  %v4088_v57 = vadd.f32 %v4080_v5, %v4072_v63 }
 0x2af   : > { %v4078_v30 = vmul.f32 %v6549_v27, %v6549_v27  ;;  %v4079_v61 = vmul.f32 %v6552_v38, %v6552_v38 }
 0x2b0   : > { %v4084_v21 = vmul.f32 %v3896_v0, %v3896_v0  ;;  %v3898_v6 = vadd.f32 %v3897_v2, %v3855_v1  ;;  %v4089_v17 = vadd.f32 %v4081_v20, %v4073_v11 }
 0x2b2   : > { %v4085_v15 = vmul.f32 %v3898_v6, %v3898_v6  ;;  %v4092_v13 = vadd.f32 %v4084_v21, %v4076_v10 }
 0x2b4   : > { %v4093_v19 = vadd.f32 %v4085_v15, %v4077_v14  ;;  %v4096_v25 = vpack.c.bf16 %v4092_v13, %v4088_v57 }
 0x2b6   : > { %v4097_v23 = vpack.c.bf16 %v4093_v19, %v4089_v17 }
 0x2b8   : > { %4388 = vmatprep.mubr.bf16.mxu0 %v4097_v23 }
 0x2b9   : > { %4389 = vmatmul.mubr.bf16.vlgmr.msra.gmra.mxu0 %v4096_v25 }
 0x2e7   : > { %v3934_v8 = vpop.f32.mrf.mxu0 }
 0x2e8   : > { %v3977_v9 = vpop.f32.mrf.mxu1 }
 0x2e9   : > { %v3936_v26 = vpop.f32.mrf.mxu0  ;;  %v3978_v41 = vadd.f32 %v3977_v9, %v3934_v8 }
 0x2ea   : > { %v3979_v28 = vpop.f32.mrf.mxu1 }
 0x2eb   : > { %v3938_v29 = vpop.f32.mrf.mxu0  ;;  %v3980_v32 = vadd.f32 %v3979_v28, %v3936_v26 }
 0x2ec   : > { %v3981_v33 = vpop.f32.mrf.mxu1 }
 0x2ed   : > { %v3940_v34 = vpop.f32.mrf.mxu0  ;;  %v3982_v46 = vadd.f32 %v3981_v33, %v3938_v29 }
 0x2ee   : > { %v3983_v35 = vpop.f32.mrf.mxu1 }
 0x2ef   : > { %v3984_v45 = vadd.f32 %v3983_v35, %v3940_v34 }
 0x327   : > { %v4020_v42 = vpop.f32.mrf.mxu0 }
 0x328   : > { %v4063_v39 = vpop.f32.mrf.mxu1  ;;  %v4021_v40 = vadd.f32 %v4020_v42, %v3978_v41 }
 0x329   : > { %v4022_v53 = vpop.f32.mrf.mxu0 }
 0x32a   : > { %v4065_v54 = vpop.f32.mrf.mxu1  ;;  %v4064_v47 = vadd.f32 %v4063_v39, %v4021_v40  ;;  %v4023_v48 = vadd.f32 %v4022_v53, %v3980_v32 }
 0x32b   : > { %v4024_v43 = vpop.f32.mrf.mxu0 }
 0x32c   : > { %v4067_v44 = vpop.f32.mrf.mxu1  ;;  %v4066_v49 = vadd.f32 %v4065_v54, %v4023_v48  ;;  %v4025_v52 = vadd.f32 %v4024_v43, %v3982_v46  ;;  %v4082_v37 = vmul.f32 %v4064_v47, %v4064_v47 }
 0x32d   : > { %v4026_v36 = vpop.f32.mrf.mxu0 }
 0x32e   : > { %v4068_v50 = vadd.f32 %v4067_v44, %v4025_v52  ;;  %v4027_v51 = vadd.f32 %v4026_v36, %v3984_v45  ;;  %v4069_v58 = vpop.f32.mrf.mxu1  ;;  %v4083_v31 = vmul.f32 %v4066_v49, %v4066_v49  ;;  %v4090_v62 = vadd.f32 %v4082_v37, %v4074_v55 }
 0x330   : > { %v4086_v4 = vmul.f32 %v4068_v50, %v4068_v50  ;;  %v4070_v59 = vadd.f32 %v4069_v58, %v4027_v51  ;;  %v4091_v1 = vadd.f32 %v4083_v31, %v4075_v60 }
 0x332   : > { %v4094_v12 = vadd.f32 %v4086_v4, %v4078_v30  ;;  %v4087_v0 = vmul.f32 %v4070_v59, %v4070_v59 }
 0x334   : > { %v4098_v56 = vpack.c.bf16 %v4094_v12, %v4090_v62  ;;  %v4095_v24 = vadd.f32 %v4087_v0, %v4079_v61 }
 0x336   : > { %v4099_v2 = vpack.c.bf16 %v4095_v24, %v4091_v1 }
 0x338   : > { %4429 = vmatprep.mubr.bf16.mxu1 %v4099_v2 }
 0x339   : > { %4430 = vmatmul.mubr.bf16.vlgmr.msra.gmra.mxu1 %v4098_v56 }
 0x379   : > { %v5148_v27 = vpop.f32.mrf.mxu0 }
 0x37b   : > { %v5149_v3 = vpop.f32.mrf.mxu0 }
 0x37c   : > { %v5150_v18 = vadd.f32 %v5149_v3, %v5148_v27 }
 0x37d   : > { %v5151_v20 = vpop.f32.mrf.mxu0 }
 0x37f   : > { %v5152_v38 = vpop.f32.mrf.mxu0 }
 0x380   : > { %v5153_v14 = vadd.f32 %v5152_v38, %v5151_v20 }
 0x3f9   : > { %v5170_v21 = vpop.f32.mrf.mxu1 }
 0x3fb   : > { %v5171_v6 = vpop.f32.mrf.mxu1 }
 0x3fc   : > { %v5172_v7 = vadd.f32 %v5171_v6, %v5170_v21 }
 0x3fd   : > { %v5173_v10 = vpop.f32.mrf.mxu1 }
 0x3fe   : > { %v4432_v5 = vadd.f32 %v5172_v7, %v5150_v18 }
 0x3ff   : > { %v5174_v11 = vpop.f32.mrf.mxu1 }
 0x400   : > { %4438 = vst [vmem:[%s260_s23] sm:$0xff] %v4432_v5  ;;  %v5175_v15 = vadd.f32 %v5174_v11, %v5173_v10 }
 0x402   : > { %v4435_v63 = vadd.f32 %v5175_v15, %v5153_v14 }
 0x404   : > { %4439 = vst [vmem:[%s260_s23 + $0x8] sm:$0xff] %v4435_v63 }
 0x405   : > { %6180 = shalt.err (!%p6177_p9)
}
 0x406   : > { %s6181_s11 = scalar_lea.hbm %s6587_s7, 256  ;;  %s6185_s28 = scalar_lea.hbm %s6634_s4, 512 }
 0x407   : > { %p6182_p1 = scmp.ne.s32.totalorder %s6587_s7, %s6181_s11  ;;  %p6186_p11 = scmp.lt.s32.totalorder %s6587_s7, %s6634_s4 }
 0x408   : > { %p6187_p13 = scmp.lt.s32.totalorder %s6185_s28, %s6181_s11 }
 0x409   : > { %p6183_p8 = pnand %p6182_p1, %p6652_p6 }
 0x40a   : > { %p6188_p2 = por %p6187_p13, %p6186_p11 }
 0x40b   : > { %p6184_p10 = pneg %p6183_p8 }
 0x40d   : > { %p6189_p4 = pnand %p6188_p2, %p6184_p10 }
 0x40f   : > { %6192 = shalt.err (!%p6189_p4)
}
 0x410   : > { %s6252_s23 = smov 128   ;;  %s6253_s12 = smov 8  }
 0x411   : > { %5190 = dma.vmem_to_hbm [thread:$0]  (%p6652_p6), %s6582_s10, 256, %s6587_s7, %s4441_s26, %s6252_s23, %s6252_s23, %s6253_s12  }
 0x412 PF: > { %s4469_s13 = sand.u32 1, %s6227_s15   ;;  %p6653_p12 = scmp.ne.s32.totalorder %s6640_s22, 0 }
 0x413   : > { %p6654_p0 = scmp.ge.s32.totalorder %s6239_s18, 2  ;;  %s4470_s14 = scalar_lea.sflag [#allocation4], %s4469_s13 }
 0x415   : > { %p5207_p5 = pnand %p6654_p0, %p6653_p12 }
 0x417   : > { %p5208_p3 = pneg %p5207_p5 }
 0x419   : > { %6222 = dma.done.wait (%p5208_p3), %s4470_s14, 256  }
 0x41a   : > { %6224 = vsyncadd (%p5208_p3), %s4470_s14, 4294967040  ;;  %p19_p7 = scmp.ge.s32.totalorder %s6359_s27, 4   ;;  %s6655_s15 = smov %s6231_s16 }
 0x41b   : > { %s6656_s16 = smov %s6235_s17  ;;  %s6657_s17 = smov %s6369_s5 }
 0x41c   : > { %s6658_s18 = smov %s6359_s27  ;;  %21 = sbr.rel (!%p19_p7) target bundleno = 7 (0x7), region = 93 }
 0x421   :  { %4475 = vsyncpa [#allocation3], 1 }
 0x422   :  { %4477 = vsyncpa [#allocation3 + $0x1], 1 }
 0x423   :  { %4478 = vsyncpa [#allocation6], 1 }
 0x424   :  { %4479 = vsyncpa [#allocation9], 1 }
 0x425   :  { %4480 = vsyncpa [#allocation4], 1 }
 0x426   :  { %4482 = vsyncpa [#allocation4 + $0x1], 1 }

</bundles_post_ra>
